<compile_context>
chip_gen: v7x
topology: tpu7x:2x2x1
jax: 0.10.0
libtpu: 0.0.40
codegen_flags: <defaults>
</compile_context>

<pallas_src>
import jax
import jax.numpy as jnp
from jax import lax
from jax.experimental import pallas as pl
from jax.experimental.pallas import tpu as pltpu


MATMUL_DTYPE = jnp.bfloat16      # MXU operand dtype (~2x throughput on v6e/v7x);
                                 # accumulation + bias/stats/BN math stay f32.
CONV_STORE_DTYPE = jnp.bfloat16  # y_conv HBM intermediate (halves 2 of 3 passes).

LANE = 128       # pad Cout to a multiple of 128 -> unmasked, lane-dense stores
SUBLANE = 8


def _round_up(x, m):
    return (x + m - 1) // m * m


def _vmem_limit_bytes():
    # v5e/v6e have 128 MiB VMEM per core, v7x only 64 MiB: leave ~25% headroom
    # and cap at 100 MiB (re-derived per generation instead of a flat 32 MiB).
    try:
        cap = int(pltpu.get_tpu_info().vmem_capacity_bytes)
    except Exception:
        cap = 64 << 20
    return min((cap * 3) // 4, 100 << 20)


def _choose_row_tile(H, W, cin_p, cout_p, budget_bytes=10 << 20):
    """Largest divisor-of-H row tile whose per-grid-step VMEM footprint fits."""
    mm_b = jnp.dtype(MATMUL_DTYPE).itemsize
    st_b = jnp.dtype(CONV_STORE_DTYPE).itemsize

    def footprint(th):
        in_band = (th + 2) * (W + 2) * cin_p * mm_b       # double buffered
        y_out = th * W * cout_p * st_b                     # double buffered
        acc = th * W * cout_p * 4                          # f32 accumulator
        return 2 * (in_band + y_out) + acc

    valid = [th for th in range(1, H + 1)
             if H % th == 0 and (th * W) % SUBLANE == 0]
    fitting = [th for th in valid if footprint(th) <= budget_bytes]
    return max(fitting) if fitting else min(valid)


def _choose_bn_tile(rows, hi=2048):
    """Largest multiple-of-8 divisor of rows that is <= hi (no degenerate 8-row tiles)."""
    for d in range(min(hi, rows), SUBLANE - 1, -1):
        if rows % d == 0 and d % SUBLANE == 0:
            return d
    return rows


def conv_stats_kernel(x_ref, w_ref, b_ref, y_ref, stats_ref):
    # x_ref    : (1, th+2, W+2, CinPad)  zero-padded NHWC row band (bf16)
    # w_ref    : (9, CinPad, CoutPad)    3x3 taps (bf16)
    # b_ref    : (1, CoutPad)            conv bias (f32, zero in padded channels)
    # y_ref    : (th*W, CoutPad)         conv+bias rows for this band (bf16)
    # stats_ref: (1, 2, CoutPad)         row 0 = sum, row 1 = sum of squares (f32)
    _, thp, wp, cin_p = x_ref.shape
    th, W = thp - 2, wp - 2
    cout_p = y_ref.shape[-1]
    x = x_ref[0]                                    # (th+2, W+2, CinPad)

    # Unrolled 9-tap accumulate: removes the im2col lane-concat / reshape
    # relayout and its 9x patch footprint; f32 accumulation of MXU results.
    # TODO(synk): for very small Cin, padding K up to 128 and fusing the taps
    # into one matmul fills the MXU contraction better (esp. on v5e).
    acc = jnp.zeros((th * W, cout_p), jnp.float32)
    for t in range(9):
        dy, dx = t // 3, t % 3
        xs = x[dy:dy + th, dx:dx + W, :].reshape(th * W, cin_p)
        acc = acc + jnp.dot(xs, w_ref[t], preferred_element_type=jnp.float32)

    y = acc + b_ref[...]
    y_ref[...] = y.astype(y_ref.dtype)              # lane-dense bf16 store

    # Per-band partial BN statistics in f32 (from the f32 accumulator, before
    # the bf16 store), so this grid axis stays fully "parallel".
    stats_ref[0] = jnp.concatenate(
        [jnp.sum(y, axis=0, keepdims=True),
         jnp.sum(y * y, axis=0, keepdims=True)], axis=0)


def bn_relu_kernel(y_ref, scale_ref, shift_ref, o_ref):
    # y_ref: (tile_rows, CoutPad) bf16; scale/shift: (1, CoutPad) f32; o_ref f32.
    y = y_ref[...].astype(jnp.float32)
    o_ref[...] = jnp.maximum(y * scale_ref[...] + shift_ref[...], 0.0)


@jax.jit
def conv_block(x_nchw, w_oihw, bias, gamma, beta):
    """Pallas ConvBlock forward. x_nchw: (N, Cin, H, W) float32 -> (N, Cout, H, W)."""
    N, Cin, H, W = x_nchw.shape
    Cout = w_oihw.shape[0]
    assert (H * W) % SUBLANE == 0, "H*W must be a multiple of 8 for row tiling"

    cin_p = _round_up(Cin, SUBLANE)
    cout_p = _round_up(Cout, LANE)
    rows = N * H * W

    th = _choose_row_tile(H, W, cin_p, cout_p)      # row-tile so blocks fit v7x VMEM
    n_tiles = H // th
    band_rows = th * W
    n_bands = N * n_tiles

    # ---- wrapper glue: layout conversion + channel/halo padding.
    # TODO(synk): keep the surrounding model NHWC end-to-end so these HBM
    # copies (transpose/pad/band-gather and the final transpose) disappear.
    x_nhwc = jnp.transpose(x_nchw, (0, 2, 3, 1)).astype(jnp.float32)
    x_pad = jnp.pad(x_nhwc, ((0, 0), (1, 1), (1, 1), (0, cin_p - Cin)))
    x_pad = x_pad.astype(MATMUL_DTYPE)
    if n_tiles == 1:
        x_bands = x_pad                              # (N, H+2, W+2, CinPad)
    else:
        # Overlapping row bands with a 1-row halo on each side.
        # TODO(synk): express the halo with pl.Element indexing on the H axis to
        # avoid duplicating the two halo rows per band in HBM.
        idx = (jnp.arange(n_tiles) * th)[:, None] + jnp.arange(th + 2)[None, :]
        x_bands = x_pad[:, idx].reshape(n_bands, th + 2, W + 2, cin_p)

    w_t = jnp.transpose(w_oihw, (2, 3, 1, 0)).astype(jnp.float32)   # (3,3,Cin,Cout)
    w_t = jnp.pad(w_t, ((0, 0), (0, 0), (0, cin_p - Cin), (0, cout_p - Cout)))
    w9 = w_t.reshape(9, cin_p, cout_p).astype(MATMUL_DTYPE)
    b2 = jnp.pad(bias.astype(jnp.float32), (0, cout_p - Cout)).reshape(1, cout_p)

    cparams = pltpu.CompilerParams(
        dimension_semantics=("parallel",),           # many bands -> both TCs on v7x
        vmem_limit_bytes=_vmem_limit_bytes())

    # ---- pass 1: conv + bias per row band, plus per-band partial BN stats.
    y_conv, stats = pl.pallas_call(
        conv_stats_kernel,
        out_shape=(jax.ShapeDtypeStruct((rows, cout_p), CONV_STORE_DTYPE),
                   jax.ShapeDtypeStruct((n_bands, 2, cout_p), jnp.float32)),
        grid=(n_bands,),
        in_specs=[
            pl.BlockSpec((1, th + 2, W + 2, cin_p), lambda g: (g, 0, 0, 0)),
            pl.BlockSpec((9, cin_p, cout_p), lambda g: (0, 0, 0)),
            pl.BlockSpec((1, cout_p), lambda g: (0, 0)),
        ],
        out_specs=(
            pl.BlockSpec((band_rows, cout_p), lambda g: (g, 0)),
            pl.BlockSpec((1, 2, cout_p), lambda g: (g, 0, 0)),
        ),
        compiler_params=cparams,
    )(x_bands, w9, b2)

    # ---- tiny reduction of the partial statistics (a few hundred floats).
    # TODO(synk): E[y^2]-E[y]^2 can cancel for large-|mean| activations; switch
    # to a Welford/offset accumulation if this drifts in real training.
    count = jnp.float32(rows)
    mean = jnp.sum(stats[:, 0, :], axis=0) / count
    var = jnp.maximum(jnp.sum(stats[:, 1, :], axis=0) / count - mean * mean, 0.0)
    gamma_p = jnp.pad(gamma.astype(jnp.float32), (0, cout_p - Cout))
    beta_p = jnp.pad(beta.astype(jnp.float32), (0, cout_p - Cout))
    scale = (gamma_p * lax.rsqrt(var + 1e-5)).reshape(1, cout_p)
    shift = (beta_p - mean * scale[0]).reshape(1, cout_p)

    # ---- pass 2: row-tiled normalize + affine + ReLU (fully parallel).
    tile_rows = _choose_bn_tile(rows)
    out_flat = pl.pallas_call(
        bn_relu_kernel,
        out_shape=jax.ShapeDtypeStruct((rows, cout_p), jnp.float32),
        grid=(rows // tile_rows,),
        in_specs=[
            pl.BlockSpec((tile_rows, cout_p), lambda i: (i, 0)),
            pl.BlockSpec((1, cout_p), lambda i: (0, 0)),
            pl.BlockSpec((1, cout_p), lambda i: (0, 0)),
        ],
        out_specs=pl.BlockSpec((tile_rows, cout_p), lambda i: (i, 0)),
        compiler_params=cparams,
    )(y_conv, scale, shift)

    out_nhwc = out_flat.reshape(N, H, W, cout_p)[..., :Cout]
    return jnp.transpose(out_nhwc, (0, 3, 1, 2))      # back to NCHW


def conv_block_reference(x_nchw, w_oihw, bias, gamma, beta):
    """Pure-JAX f32 reference for correctness checking."""
    y = lax.conv_general_dilated(
        x_nchw, w_oihw, window_strides=(1, 1), padding=((1, 1), (1, 1)),
        dimension_numbers=("NCHW", "OIHW", "NCHW"))
    y = y + bias.reshape(1, -1, 1, 1)
    mean = jnp.mean(y, axis=(0, 2, 3), keepdims=True)
    var = jnp.mean((y - mean) ** 2, axis=(0, 2, 3), keepdims=True)
    y = (y - mean) * lax.rsqrt(var + 1e-5)
    y = y * gamma.reshape(1, -1, 1, 1) + beta.reshape(1, -1, 1, 1)
    return jnp.maximum(y, 0.0)


if __name__ == "__main__":
    N, Cin, Cout, H, W = 2, 4, 8, 16, 16

    key = jax.random.PRNGKey(0)
    kx, kw, kb = jax.random.split(key, 3)
    x = jax.random.normal(kx, (N, Cin, H, W), dtype=jnp.float32)
    # Deterministic synthetic parameters (shapes per nn.Conv2d / nn.BatchNorm2d).
    w = jax.random.normal(kw, (Cout, Cin, 3, 3), dtype=jnp.float32) * 0.1
    b = jax.random.normal(kb, (Cout,), dtype=jnp.float32) * 0.1
    gamma = jnp.ones((Cout,), dtype=jnp.float32)   # BN weight init
    beta = jnp.zeros((Cout,), dtype=jnp.float32)   # BN bias init

    out = jax.block_until_ready(conv_block(x, w, b, gamma, beta))
    ref = jax.block_until_ready(conv_block_reference(x, w, b, gamma, beta))

    assert out.shape == (N, Cout, H, W)
    err = float(jnp.max(jnp.abs(out - ref)))
    # bf16 MXU operands + bf16 y_conv intermediate vs all-f32 reference:
    # BN-normalized outputs are ~unit scale, so allow ~3e-2 absolute error.
    assert err < 3e-2, f"max abs err {err}"
    print("KERNEL_OK")
</pallas_src>

<mosaic_0001>
module attributes {stable_mosaic.version = 11 : i64} {
  func.func @conv_stats_kernel(%arg0: i32, %arg1: memref<1x18x18x8xbf16, #tpu.memory_space<vmem>>, %arg2: memref<9x8x128xbf16, #tpu.memory_space<vmem>>, %arg3: memref<1x128xf32, #tpu.memory_space<vmem>>, %arg4: memref<256x128xbf16, #tpu.memory_space<vmem>>, %arg5: memref<1x2x128xf32, #tpu.memory_space<vmem>>) attributes {dimension_semantics = [#tpu.dimension_semantics<parallel>], iteration_bounds = array<i64: 2>, scalar_prefetch = 0 : i64, scratch_operands = 0 : i64, tpu.core_type = #tpu.core_type<tc>, window_params = [{transform_indices = @transform_0, window_bounds = array<i64: 1, 18, 18, 8>}, {pipeline_mode = #tpu.pipeline_mode<synchronous>, transform_indices = @transform_1, window_bounds = array<i64: 9, 8, 128>}, {pipeline_mode = #tpu.pipeline_mode<synchronous>, transform_indices = @transform_2, window_bounds = array<i64: 1, 128>}, {transform_indices = @transform_3, window_bounds = array<i64: 256, 128>}, {transform_indices = @transform_4, window_bounds = array<i64: 1, 2, 128>}]} {
    %c0 = arith.constant 0 : index
    %c0_0 = arith.constant 0 : index
    %c0_1 = arith.constant 0 : index
    %c0_2 = arith.constant 0 : index
    %0 = vector.load %arg1[%c0, %c0_0, %c0_1, %c0_2] : memref<1x18x18x8xbf16, #tpu.memory_space<vmem>>, vector<1x18x18x8xbf16>
    %1 = vector.shape_cast %0 : vector<1x18x18x8xbf16> to vector<18x18x8xbf16>
    %cst = arith.constant 0.000000e+00 : f32
    %2 = vector.broadcast %cst : f32 to vector<256x128xf32>
    %3 = vector.extract_strided_slice %1 {offsets = [0, 0, 0], sizes = [16, 16, 8], strides = [1, 1, 1]} : vector<18x18x8xbf16> to vector<16x16x8xbf16>
    %4 = vector.shape_cast %3 : vector<16x16x8xbf16> to vector<256x8xbf16>
    %c0_3 = arith.constant 0 : index
    %c0_4 = arith.constant 0 : index
    %c0_5 = arith.constant 0 : index
    %5 = vector.load %arg2[%c0_3, %c0_4, %c0_5] : memref<9x8x128xbf16, #tpu.memory_space<vmem>>, vector<1x8x128xbf16>
    %6 = vector.shape_cast %5 : vector<1x8x128xbf16> to vector<8x128xbf16>
    %cst_6 = arith.constant dense<0.000000e+00> : vector<256x128xf32>
    %7 = tpu.matmul %4, %6, %cst_6 {dimension_numbers = #tpu.dot_dimension_numbers<[1], [0], [0], [1], [0, 0, 1, 1], [], []>} : vector<256x8xbf16>, vector<8x128xbf16>, vector<256x128xf32> -> vector<256x128xf32>
    %8 = arith.addf %2, %7 : vector<256x128xf32>
    %9 = vector.extract_strided_slice %1 {offsets = [0, 1, 0], sizes = [16, 16, 8], strides = [1, 1, 1]} : vector<18x18x8xbf16> to vector<16x16x8xbf16>
    %10 = vector.shape_cast %9 : vector<16x16x8xbf16> to vector<256x8xbf16>
    %c1 = arith.constant 1 : index
    %c0_7 = arith.constant 0 : index
    %c0_8 = arith.constant 0 : index
    %11 = vector.load %arg2[%c1, %c0_7, %c0_8] : memref<9x8x128xbf16, #tpu.memory_space<vmem>>, vector<1x8x128xbf16>
    %12 = vector.shape_cast %11 : vector<1x8x128xbf16> to vector<8x128xbf16>
    %cst_9 = arith.constant dense<0.000000e+00> : vector<256x128xf32>
    %13 = tpu.matmul %10, %12, %cst_9 {dimension_numbers = #tpu.dot_dimension_numbers<[1], [0], [0], [1], [0, 0, 1, 1], [], []>} : vector<256x8xbf16>, vector<8x128xbf16>, vector<256x128xf32> -> vector<256x128xf32>
    %14 = arith.addf %8, %13 : vector<256x128xf32>
    %15 = vector.extract_strided_slice %1 {offsets = [0, 2, 0], sizes = [16, 16, 8], strides = [1, 1, 1]} : vector<18x18x8xbf16> to vector<16x16x8xbf16>
    %16 = vector.shape_cast %15 : vector<16x16x8xbf16> to vector<256x8xbf16>
    %c2 = arith.constant 2 : index
    %c0_10 = arith.constant 0 : index
    %c0_11 = arith.constant 0 : index
    %17 = vector.load %arg2[%c2, %c0_10, %c0_11] : memref<9x8x128xbf16, #tpu.memory_space<vmem>>, vector<1x8x128xbf16>
    %18 = vector.shape_cast %17 : vector<1x8x128xbf16> to vector<8x128xbf16>
    %cst_12 = arith.constant dense<0.000000e+00> : vector<256x128xf32>
    %19 = tpu.matmul %16, %18, %cst_12 {dimension_numbers = #tpu.dot_dimension_numbers<[1], [0], [0], [1], [0, 0, 1, 1], [], []>} : vector<256x8xbf16>, vector<8x128xbf16>, vector<256x128xf32> -> vector<256x128xf32>
    %20 = arith.addf %14, %19 : vector<256x128xf32>
    %21 = vector.extract_strided_slice %1 {offsets = [1, 0, 0], sizes = [16, 16, 8], strides = [1, 1, 1]} : vector<18x18x8xbf16> to vector<16x16x8xbf16>
    %22 = vector.shape_cast %21 : vector<16x16x8xbf16> to vector<256x8xbf16>
    %c3 = arith.constant 3 : index
    %c0_13 = arith.constant 0 : index
    %c0_14 = arith.constant 0 : index
    %23 = vector.load %arg2[%c3, %c0_13, %c0_14] : memref<9x8x128xbf16, #tpu.memory_space<vmem>>, vector<1x8x128xbf16>
    %24 = vector.shape_cast %23 : vector<1x8x128xbf16> to vector<8x128xbf16>
    %cst_15 = arith.constant dense<0.000000e+00> : vector<256x128xf32>
    %25 = tpu.matmul %22, %24, %cst_15 {dimension_numbers = #tpu.dot_dimension_numbers<[1], [0], [0], [1], [0, 0, 1, 1], [], []>} : vector<256x8xbf16>, vector<8x128xbf16>, vector<256x128xf32> -> vector<256x128xf32>
    %26 = arith.addf %20, %25 : vector<256x128xf32>
    %27 = vector.extract_strided_slice %1 {offsets = [1, 1, 0], sizes = [16, 16, 8], strides = [1, 1, 1]} : vector<18x18x8xbf16> to vector<16x16x8xbf16>
    %28 = vector.shape_cast %27 : vector<16x16x8xbf16> to vector<256x8xbf16>
    %c4 = arith.constant 4 : index
    %c0_16 = arith.constant 0 : index
    %c0_17 = arith.constant 0 : index
    %29 = vector.load %arg2[%c4, %c0_16, %c0_17] : memref<9x8x128xbf16, #tpu.memory_space<vmem>>, vector<1x8x128xbf16>
    %30 = vector.shape_cast %29 : vector<1x8x128xbf16> to vector<8x128xbf16>
    %cst_18 = arith.constant dense<0.000000e+00> : vector<256x128xf32>
    %31 = tpu.matmul %28, %30, %cst_18 {dimension_numbers = #tpu.dot_dimension_numbers<[1], [0], [0], [1], [0, 0, 1, 1], [], []>} : vector<256x8xbf16>, vector<8x128xbf16>, vector<256x128xf32> -> vector<256x128xf32>
    %32 = arith.addf %26, %31 : vector<256x128xf32>
    %33 = vector.extract_strided_slice %1 {offsets = [1, 2, 0], sizes = [16, 16, 8], strides = [1, 1, 1]} : vector<18x18x8xbf16> to vector<16x16x8xbf16>
    %34 = vector.shape_cast %33 : vector<16x16x8xbf16> to vector<256x8xbf16>
    %c5 = arith.constant 5 : index
    %c0_19 = arith.constant 0 : index
    %c0_20 = arith.constant 0 : index
    %35 = vector.load %arg2[%c5, %c0_19, %c0_20] : memref<9x8x128xbf16, #tpu.memory_space<vmem>>, vector<1x8x128xbf16>
    %36 = vector.shape_cast %35 : vector<1x8x128xbf16> to vector<8x128xbf16>
    %cst_21 = arith.constant dense<0.000000e+00> : vector<256x128xf32>
    %37 = tpu.matmul %34, %36, %cst_21 {dimension_numbers = #tpu.dot_dimension_numbers<[1], [0], [0], [1], [0, 0, 1, 1], [], []>} : vector<256x8xbf16>, vector<8x128xbf16>, vector<256x128xf32> -> vector<256x128xf32>
    %38 = arith.addf %32, %37 : vector<256x128xf32>
    %39 = vector.extract_strided_slice %1 {offsets = [2, 0, 0], sizes = [16, 16, 8], strides = [1, 1, 1]} : vector<18x18x8xbf16> to vector<16x16x8xbf16>
    %40 = vector.shape_cast %39 : vector<16x16x8xbf16> to vector<256x8xbf16>
    %c6 = arith.constant 6 : index
    %c0_22 = arith.constant 0 : index
    %c0_23 = arith.constant 0 : index
    %41 = vector.load %arg2[%c6, %c0_22, %c0_23] : memref<9x8x128xbf16, #tpu.memory_space<vmem>>, vector<1x8x128xbf16>
    %42 = vector.shape_cast %41 : vector<1x8x128xbf16> to vector<8x128xbf16>
    %cst_24 = arith.constant dense<0.000000e+00> : vector<256x128xf32>
    %43 = tpu.matmul %40, %42, %cst_24 {dimension_numbers = #tpu.dot_dimension_numbers<[1], [0], [0], [1], [0, 0, 1, 1], [], []>} : vector<256x8xbf16>, vector<8x128xbf16>, vector<256x128xf32> -> vector<256x128xf32>
    %44 = arith.addf %38, %43 : vector<256x128xf32>
    %45 = vector.extract_strided_slice %1 {offsets = [2, 1, 0], sizes = [16, 16, 8], strides = [1, 1, 1]} : vector<18x18x8xbf16> to vector<16x16x8xbf16>
    %46 = vector.shape_cast %45 : vector<16x16x8xbf16> to vector<256x8xbf16>
    %c7 = arith.constant 7 : index
    %c0_25 = arith.constant 0 : index
    %c0_26 = arith.constant 0 : index
    %47 = vector.load %arg2[%c7, %c0_25, %c0_26] : memref<9x8x128xbf16, #tpu.memory_space<vmem>>, vector<1x8x128xbf16>
    %48 = vector.shape_cast %47 : vector<1x8x128xbf16> to vector<8x128xbf16>
    %cst_27 = arith.constant dense<0.000000e+00> : vector<256x128xf32>
    %49 = tpu.matmul %46, %48, %cst_27 {dimension_numbers = #tpu.dot_dimension_numbers<[1], [0], [0], [1], [0, 0, 1, 1], [], []>} : vector<256x8xbf16>, vector<8x128xbf16>, vector<256x128xf32> -> vector<256x128xf32>
    %50 = arith.addf %44, %49 : vector<256x128xf32>
    %51 = vector.extract_strided_slice %1 {offsets = [2, 2, 0], sizes = [16, 16, 8], strides = [1, 1, 1]} : vector<18x18x8xbf16> to vector<16x16x8xbf16>
    %52 = vector.shape_cast %51 : vector<16x16x8xbf16> to vector<256x8xbf16>
    %c8 = arith.constant 8 : index
    %c0_28 = arith.constant 0 : index
    %c0_29 = arith.constant 0 : index
    %53 = vector.load %arg2[%c8, %c0_28, %c0_29] : memref<9x8x128xbf16, #tpu.memory_space<vmem>>, vector<1x8x128xbf16>
    %54 = vector.shape_cast %53 : vector<1x8x128xbf16> to vector<8x128xbf16>
    %cst_30 = arith.constant dense<0.000000e+00> : vector<256x128xf32>
    %55 = tpu.matmul %52, %54, %cst_30 {dimension_numbers = #tpu.dot_dimension_numbers<[1], [0], [0], [1], [0, 0, 1, 1], [], []>} : vector<256x8xbf16>, vector<8x128xbf16>, vector<256x128xf32> -> vector<256x128xf32>
    %56 = arith.addf %50, %55 : vector<256x128xf32>
    %c0_31 = arith.constant 0 : index
    %c0_32 = arith.constant 0 : index
    %57 = vector.load %arg3[%c0_31, %c0_32] : memref<1x128xf32, #tpu.memory_space<vmem>>, vector<1x128xf32>
    %58 = vector.broadcast %57 : vector<1x128xf32> to vector<256x128xf32>
    %59 = arith.addf %56, %58 : vector<256x128xf32>
    %60 = arith.truncf %59 : vector<256x128xf32> to vector<256x128xbf16>
    %c0_33 = arith.constant 0 : index
    %c0_34 = arith.constant 0 : index
    %61 = vector.load %arg4[%c0_33, %c0_34] : memref<256x128xbf16, #tpu.memory_space<vmem>>, vector<256x128xbf16>
    tpu.vector_store %arg4[%c0_33, %c0_34], %60 {strides = array<i32>} : memref<256x128xbf16, #tpu.memory_space<vmem>>, vector<256x128xbf16>,
    %cst_35 = arith.constant dense<0.000000e+00> : vector<128xf32>
    %62 = vector.multi_reduction <add>, %59, %cst_35 [0] : vector<256x128xf32> to vector<128xf32>
    %63 = vector.shape_cast %62 : vector<128xf32> to vector<1x128xf32>
    %64 = arith.mulf %59, %59 : vector<256x128xf32>
    %cst_36 = arith.constant dense<0.000000e+00> : vector<128xf32>
    %65 = vector.multi_reduction <add>, %64, %cst_36 [0] : vector<256x128xf32> to vector<128xf32>
    %66 = vector.shape_cast %65 : vector<128xf32> to vector<1x128xf32>
    %67 = tpu.concatenate %63, %66 in 0 : vector<1x128xf32>, vector<1x128xf32> -> vector<2x128xf32>
    %c0_37 = arith.constant 0 : index
    %c0_38 = arith.constant 0 : index
    %c0_39 = arith.constant 0 : index
    %68 = vector.load %arg5[%c0_37, %c0_38, %c0_39] : memref<1x2x128xf32, #tpu.memory_space<vmem>>, vector<1x2x128xf32>
    %69 = vector.shape_cast %68 : vector<1x2x128xf32> to vector<2x128xf32>
    %70 = vector.shape_cast %67 : vector<2x128xf32> to vector<1x2x128xf32>
    tpu.vector_store %arg5[%c0_37, %c0_38, %c0_39], %70 {strides = array<i32>} : memref<1x2x128xf32, #tpu.memory_space<vmem>>, vector<1x2x128xf32>,
    return
  }
  func.func @transform_0(%arg0: i32) -> (i32, i32, i32, i32) {
    %c0_i32 = arith.constant 0 : i32
    %c0_i32_0 = arith.constant 0 : i32
    %c0_i32_1 = arith.constant 0 : i32
    %c0_i32_2 = arith.constant 0 : i32
    return %arg0, %c0_i32, %c0_i32_0, %c0_i32_1 : i32, i32, i32, i32
  }
  func.func @transform_1(%arg0: i32) -> (i32, i32, i32) {
    %c0_i32 = arith.constant 0 : i32
    %c0_i32_0 = arith.constant 0 : i32
    %c0_i32_1 = arith.constant 0 : i32
    %c0_i32_2 = arith.constant 0 : i32
    return %c0_i32, %c0_i32_0, %c0_i32_1 : i32, i32, i32
  }
  func.func @transform_2(%arg0: i32) -> (i32, i32) {
    %c0_i32 = arith.constant 0 : i32
    %c0_i32_0 = arith.constant 0 : i32
    %c0_i32_1 = arith.constant 0 : i32
    return %c0_i32, %c0_i32_0 : i32, i32
  }
  func.func @transform_3(%arg0: i32) -> (i32, i32) {
    %c0_i32 = arith.constant 0 : i32
    %c0_i32_0 = arith.constant 0 : i32
    return %arg0, %c0_i32 : i32, i32
  }
  func.func @transform_4(%arg0: i32) -> (i32, i32, i32) {
    %c0_i32 = arith.constant 0 : i32
    %c0_i32_0 = arith.constant 0 : i32
    %c0_i32_1 = arith.constant 0 : i32
    return %arg0, %c0_i32, %c0_i32_0 : i32, i32, i32
  }
}

module attributes {stable_mosaic.version = 11 : i64} {
  func.func @bn_relu_kernel(%arg0: i32, %arg1: memref<512x128xbf16, #tpu.memory_space<vmem>>, %arg2: memref<1x128xf32, #tpu.memory_space<vmem>>, %arg3: memref<1x128xf32, #tpu.memory_space<vmem>>, %arg4: memref<512x128xf32, #tpu.memory_space<vmem>>) attributes {dimension_semantics = [#tpu.dimension_semantics<parallel>], iteration_bounds = array<i64: 1>, scalar_prefetch = 0 : i64, scratch_operands = 0 : i64, tpu.core_type = #tpu.core_type<tc>, window_params = [{transform_indices = @transform_0, window_bounds = array<i64: 512, 128>}, {pipeline_mode = #tpu.pipeline_mode<synchronous>, transform_indices = @transform_1, window_bounds = array<i64: 1, 128>}, {pipeline_mode = #tpu.pipeline_mode<synchronous>, transform_indices = @transform_2, window_bounds = array<i64: 1, 128>}, {transform_indices = @transform_3, window_bounds = array<i64: 512, 128>}]} {
    %c0 = arith.constant 0 : index
    %c0_0 = arith.constant 0 : index
    %0 = vector.load %arg1[%c0, %c0_0] : memref<512x128xbf16, #tpu.memory_space<vmem>>, vector<512x128xbf16>
    %1 = arith.extf %0 : vector<512x128xbf16> to vector<512x128xf32>
    %c0_1 = arith.constant 0 : index
    %c0_2 = arith.constant 0 : index
    %2 = vector.load %arg2[%c0_1, %c0_2] : memref<1x128xf32, #tpu.memory_space<vmem>>, vector<1x128xf32>
    %3 = vector.broadcast %2 : vector<1x128xf32> to vector<512x128xf32>
    %4 = arith.mulf %1, %3 : vector<512x128xf32>
    %c0_3 = arith.constant 0 : index
    %c0_4 = arith.constant 0 : index
    %5 = vector.load %arg3[%c0_3, %c0_4] : memref<1x128xf32, #tpu.memory_space<vmem>>, vector<1x128xf32>
    %6 = vector.broadcast %5 : vector<1x128xf32> to vector<512x128xf32>
    %7 = arith.addf %4, %6 : vector<512x128xf32>
    %cst = arith.constant 0.000000e+00 : f32
    %8 = vector.broadcast %cst : f32 to vector<512x128xf32>
    %9 = arith.maximumf %7, %8 : vector<512x128xf32>
    %c0_5 = arith.constant 0 : index
    %c0_6 = arith.constant 0 : index
    %10 = vector.load %arg4[%c0_5, %c0_6] : memref<512x128xf32, #tpu.memory_space<vmem>>, vector<512x128xf32>
    tpu.vector_store %arg4[%c0_5, %c0_6], %9 {strides = array<i32>} : memref<512x128xf32, #tpu.memory_space<vmem>>, vector<512x128xf32>,
    return
  }
  func.func @transform_0(%arg0: i32) -> (i32, i32) {
    %c0_i32 = arith.constant 0 : i32
    %c0_i32_0 = arith.constant 0 : i32
    return %arg0, %c0_i32 : i32, i32
  }
  func.func @transform_1(%arg0: i32) -> (i32, i32) {
    %c0_i32 = arith.constant 0 : i32
    %c0_i32_0 = arith.constant 0 : i32
    %c0_i32_1 = arith.constant 0 : i32
    return %c0_i32, %c0_i32_0 : i32, i32
  }
  func.func @transform_2(%arg0: i32) -> (i32, i32) {
    %c0_i32 = arith.constant 0 : i32
    %c0_i32_0 = arith.constant 0 : i32
    %c0_i32_1 = arith.constant 0 : i32
    return %c0_i32, %c0_i32_0 : i32, i32
  }
  func.func @transform_3(%arg0: i32) -> (i32, i32) {
    %c0_i32 = arith.constant 0 : i32
    %c0_i32_0 = arith.constant 0 : i32
    return %arg0, %c0_i32 : i32, i32
  }
}

</mosaic_0001>

<bundles_post_ra>
// kernel: conv_block.3
= control target key start
LH: loop header
LB: loop body
LE: loop exit
PB: predicated region body
PF: predicated region fallthrough
CT: control target
= control target key end

     0   :  { %s1023_s0 = inlined_call_operand.vmem [shape: bf16[512,128], index: 0, kind: input, shape index: {}]   ;;  %s1024_s1 = inlined_call_operand.vmem [shape: f32[1,128], index: 1, kind: input, shape index: {}]   ;;  %s1025_s2 = inlined_call_operand.vmem [shape: f32[1,128], index: 2, kind: input, shape index: {}]   ;;  %s1026_s3 = inlined_call_operand.vmem [shape: f32[512,128], index: 3, kind: output, shape index: {}]  }
   0x1   :  { %v419_v0 = vld [vmem:[%s1023_s0] sm:$0xff]   ;;  %v546_v4 = vld [vmem:[%s1023_s0 + $0x8] sm:$0xff]   ;;  %v547_v5 = vld [vmem:[%s1023_s0 + $0x10] sm:$0xff]  }
   0x2   :  { %v603_v1 = vld [vmem:[%s1024_s1] ss:$0 sm:$0xff]  ;;  %v420_v2 = vunpack.c.l.bf16 %v419_v0  ;;  %v421_v3 = vunpack.c.h.bf16 %v419_v0  ;;  %v548_v6 = vld [vmem:[%s1023_s0 + $0x18] sm:$0xff]   ;;  %v424_v8 = vunpack.c.l.bf16 %v546_v4  ;;  %v425_v9 = vunpack.c.h.bf16 %v546_v4  ;;  %v550_v33 = vld [vmem:[%s1023_s0 + $0x28] sm:$0xff]  }
   0x3   :  { %v617_v7 = vld [vmem:[%s1025_s2] ss:$0 sm:$0xff]  ;;  %v428_v10 = vunpack.c.l.bf16 %v547_v5  ;;  %v429_v11 = vunpack.c.h.bf16 %v547_v5  ;;  %v432_v14 = vunpack.c.l.bf16 %v548_v6  ;;  %v433_v15 = vunpack.c.h.bf16 %v548_v6  ;;  %v551_v34 = vld [vmem:[%s1023_s0 + $0x30] sm:$0xff]   ;;  %v552_v39 = vld [vmem:[%s1023_s0 + $0x38] sm:$0xff]  }
   0x4   :  { %v149_v12 = vmul.f32 %v420_v2, %v603_v1  ;;  %v150_v13 = vmul.f32 %v421_v3, %v603_v1  ;;  %v151_v16 = vmul.f32 %v424_v8, %v603_v1  ;;  %v152_v17 = vmul.f32 %v425_v9, %v603_v1  ;;  %v549_v28 = vld [vmem:[%s1023_s0 + $0x20] sm:$0xff]   ;;  %v554_v6 = vld [vmem:[%s1023_s0 + $0x48] sm:$0xff]   ;;  %v555_v8 = vld [vmem:[%s1023_s0 + $0x50] sm:$0xff]  }
   0x5   :  { %v153_v18 = vmul.f32 %v428_v10, %v603_v1  ;;  %v154_v19 = vmul.f32 %v429_v11, %v603_v1  ;;  %v155_v22 = vmul.f32 %v432_v14, %v603_v1  ;;  %v156_v23 = vmul.f32 %v433_v15, %v603_v1  ;;  %v553_v0 = vld [vmem:[%s1023_s0 + $0x40] sm:$0xff]  }
   0x6   :  { %v220_v20 = vadd.f32 %v617_v7, %v149_v12  ;;  %v221_v21 = vadd.f32 %v617_v7, %v150_v13  ;;  %v222_v24 = vadd.f32 %v617_v7, %v151_v16  ;;  %v223_v25 = vadd.f32 %v617_v7, %v152_v17  ;;  %v556_v13 = vld [vmem:[%s1023_s0 + $0x58] sm:$0xff]  }
   0x7   :  { %v224_v26 = vadd.f32 %v617_v7, %v153_v18  ;;  %v225_v27 = vadd.f32 %v617_v7, %v154_v19  ;;  %v226_v31 = vadd.f32 %v617_v7, %v155_v22  ;;  %v227_v32 = vadd.f32 %v617_v7, %v156_v23 }
   0x8   :  { %v284_v29 = vmax.f32 %v220_v20, 0.0  ;;  %v285_v30 = vmax.f32 %v221_v21, 0.0  ;;  %v286_v35 = vmax.f32 %v222_v24, 0.0  ;;  %v287_v36 = vmax.f32 %v223_v25, 0.0 }
   0x9   :  { %v288_v37 = vmax.f32 %v224_v26, 0.0  ;;  %v289_v38 = vmax.f32 %v225_v27, 0.0  ;;  %v290_v40 = vmax.f32 %v226_v31, 0.0  ;;  %v291_v41 = vmax.f32 %v227_v32, 0.0 }
   0xa   :  { %348 = vst [vmem:[%s1026_s3] sm:$0xff] %v284_v29  ;;  %349 = vst [vmem:[%s1026_s3 + $0x8] sm:$0xff] %v285_v30  ;;  %v436_v42 = vunpack.c.l.bf16 %v549_v28  ;;  %v437_v43 = vunpack.c.h.bf16 %v549_v28  ;;  %v440_v44 = vunpack.c.l.bf16 %v550_v33  ;;  %v441_v45 = vunpack.c.h.bf16 %v550_v33 }
   0xb   :  { %350 = vst [vmem:[%s1026_s3 + $0x10] sm:$0xff] %v286_v35  ;;  %351 = vst [vmem:[%s1026_s3 + $0x18] sm:$0xff] %v287_v36  ;;  %v444_v46 = vunpack.c.l.bf16 %v551_v34  ;;  %v445_v47 = vunpack.c.h.bf16 %v551_v34  ;;  %v448_v50 = vunpack.c.l.bf16 %v552_v39  ;;  %v449_v51 = vunpack.c.h.bf16 %v552_v39 }
   0xc   :  { %352 = vst [vmem:[%s1026_s3 + $0x20] sm:$0xff] %v288_v37  ;;  %353 = vst [vmem:[%s1026_s3 + $0x28] sm:$0xff] %v289_v38  ;;  %v157_v48 = vmul.f32 %v436_v42, %v603_v1  ;;  %v158_v49 = vmul.f32 %v437_v43, %v603_v1  ;;  %v159_v52 = vmul.f32 %v440_v44, %v603_v1  ;;  %v452_v16 = vunpack.c.l.bf16 %v553_v0  ;;  %v557_v38 = vld [vmem:[%s1023_s0 + $0x60] sm:$0xff]   ;;  %v558_v43 = vld [vmem:[%s1023_s0 + $0x68] sm:$0xff]  }
   0xd   :  { %354 = vst [vmem:[%s1026_s3 + $0x30] sm:$0xff] %v290_v40  ;;  %355 = vst [vmem:[%s1026_s3 + $0x38] sm:$0xff] %v291_v41  ;;  %v160_v53 = vmul.f32 %v441_v45, %v603_v1  ;;  %v161_v54 = vmul.f32 %v444_v46, %v603_v1  ;;  %v162_v55 = vmul.f32 %v445_v47, %v603_v1  ;;  %v453_v17 = vunpack.c.h.bf16 %v553_v0  ;;  %v559_v44 = vld [vmem:[%s1023_s0 + $0x70] sm:$0xff]  }
   0xe   :  { %v228_v56 = vadd.f32 %v617_v7, %v157_v48  ;;  %v229_v57 = vadd.f32 %v617_v7, %v158_v49  ;;  %v163_v58 = vmul.f32 %v448_v50, %v603_v1  ;;  %v164_v59 = vmul.f32 %v449_v51, %v603_v1  ;;  %v560_v49 = vld [vmem:[%s1023_s0 + $0x78] sm:$0xff]  }
   0xf   :  { %v230_v60 = vadd.f32 %v617_v7, %v159_v52  ;;  %v231_v61 = vadd.f32 %v617_v7, %v160_v53  ;;  %v232_v62 = vadd.f32 %v617_v7, %v161_v54  ;;  %v233_v63 = vadd.f32 %v617_v7, %v162_v55 }
  0x10   :  { %v292_v2 = vmax.f32 %v228_v56, 0.0  ;;  %v293_v3 = vmax.f32 %v229_v57, 0.0  ;;  %v234_v4 = vadd.f32 %v617_v7, %v163_v58  ;;  %v235_v5 = vadd.f32 %v617_v7, %v164_v59 }
  0x11   :  { %v294_v9 = vmax.f32 %v230_v60, 0.0  ;;  %v295_v10 = vmax.f32 %v231_v61, 0.0  ;;  %v296_v11 = vmax.f32 %v232_v62, 0.0  ;;  %v297_v12 = vmax.f32 %v233_v63, 0.0 }
  0x12   :  { %356 = vst [vmem:[%s1026_s3 + $0x40] sm:$0xff] %v292_v2  ;;  %357 = vst [vmem:[%s1026_s3 + $0x48] sm:$0xff] %v293_v3  ;;  %v298_v14 = vmax.f32 %v234_v4, 0.0  ;;  %v299_v15 = vmax.f32 %v235_v5, 0.0  ;;  %v456_v18 = vunpack.c.l.bf16 %v554_v6  ;;  %v457_v19 = vunpack.c.h.bf16 %v554_v6 }
  0x13   :  { %358 = vst [vmem:[%s1026_s3 + $0x50] sm:$0xff] %v294_v9  ;;  %359 = vst [vmem:[%s1026_s3 + $0x58] sm:$0xff] %v295_v10  ;;  %v460_v20 = vunpack.c.l.bf16 %v555_v8  ;;  %v461_v21 = vunpack.c.h.bf16 %v555_v8  ;;  %v165_v22 = vmul.f32 %v452_v16, %v603_v1  ;;  %v166_v23 = vmul.f32 %v453_v17, %v603_v1  ;;  %v562_v17 = vld [vmem:[%s1023_s0 + $0x88] sm:$0xff]  }
  0x14   :  { %360 = vst [vmem:[%s1026_s3 + $0x60] sm:$0xff] %v296_v11  ;;  %361 = vst [vmem:[%s1026_s3 + $0x68] sm:$0xff] %v297_v12  ;;  %v464_v24 = vunpack.c.l.bf16 %v556_v13  ;;  %v465_v25 = vunpack.c.h.bf16 %v556_v13  ;;  %v167_v26 = vmul.f32 %v456_v18, %v603_v1  ;;  %v168_v27 = vmul.f32 %v457_v19, %v603_v1  ;;  %v561_v12 = vld [vmem:[%s1023_s0 + $0x80] sm:$0xff]   ;;  %v563_v18 = vld [vmem:[%s1023_s0 + $0x90] sm:$0xff]  }
  0x15   :  { %362 = vst [vmem:[%s1026_s3 + $0x70] sm:$0xff] %v298_v14  ;;  %363 = vst [vmem:[%s1026_s3 + $0x78] sm:$0xff] %v299_v15  ;;  %v169_v28 = vmul.f32 %v460_v20, %v603_v1  ;;  %v170_v29 = vmul.f32 %v461_v21, %v603_v1  ;;  %v236_v30 = vadd.f32 %v617_v7, %v165_v22  ;;  %v468_v52 = vunpack.c.l.bf16 %v557_v38 }
  0x16   :  { %v237_v31 = vadd.f32 %v617_v7, %v166_v23  ;;  %v171_v32 = vmul.f32 %v464_v24, %v603_v1  ;;  %v172_v33 = vmul.f32 %v465_v25, %v603_v1  ;;  %v238_v34 = vadd.f32 %v617_v7, %v167_v26  ;;  %v564_v23 = vld [vmem:[%s1023_s0 + $0x98] sm:$0xff]  }
  0x17   :  { %v239_v35 = vadd.f32 %v617_v7, %v168_v27  ;;  %v240_v36 = vadd.f32 %v617_v7, %v169_v28  ;;  %v241_v37 = vadd.f32 %v617_v7, %v170_v29  ;;  %v300_v39 = vmax.f32 %v236_v30, 0.0 }
  0x18   :  { %v301_v40 = vmax.f32 %v237_v31, 0.0  ;;  %v242_v41 = vadd.f32 %v617_v7, %v171_v32  ;;  %v243_v42 = vadd.f32 %v617_v7, %v172_v33  ;;  %v302_v45 = vmax.f32 %v238_v34, 0.0 }
  0x19   :  { %v303_v46 = vmax.f32 %v239_v35, 0.0  ;;  %v304_v47 = vmax.f32 %v240_v36, 0.0  ;;  %v305_v48 = vmax.f32 %v241_v37, 0.0  ;;  %364 = vst [vmem:[%s1026_s3 + $0x80] sm:$0xff] %v300_v39  ;;  %v469_v53 = vunpack.c.h.bf16 %v557_v38 }
  0x1a   :  { %365 = vst [vmem:[%s1026_s3 + $0x88] sm:$0xff] %v301_v40  ;;  %v306_v50 = vmax.f32 %v242_v41, 0.0  ;;  %v307_v51 = vmax.f32 %v243_v42, 0.0  ;;  %366 = vst [vmem:[%s1026_s3 + $0x90] sm:$0xff] %v302_v45  ;;  %v472_v54 = vunpack.c.l.bf16 %v558_v43  ;;  %v473_v55 = vunpack.c.h.bf16 %v558_v43 }
  0x1b   :  { %367 = vst [vmem:[%s1026_s3 + $0x98] sm:$0xff] %v303_v46  ;;  %368 = vst [vmem:[%s1026_s3 + $0xa0] sm:$0xff] %v304_v47  ;;  %v476_v56 = vunpack.c.l.bf16 %v559_v44  ;;  %v477_v57 = vunpack.c.h.bf16 %v559_v44  ;;  %v173_v58 = vmul.f32 %v468_v52, %v603_v1  ;;  %v174_v59 = vmul.f32 %v469_v53, %v603_v1  ;;  %v566_v53 = vld [vmem:[%s1023_s0 + $0xa8] sm:$0xff]  }
  0x1c   :  { %369 = vst [vmem:[%s1026_s3 + $0xa8] sm:$0xff] %v305_v48  ;;  %370 = vst [vmem:[%s1026_s3 + $0xb0] sm:$0xff] %v306_v50  ;;  %v480_v60 = vunpack.c.l.bf16 %v560_v49  ;;  %v481_v61 = vunpack.c.h.bf16 %v560_v49  ;;  %v175_v62 = vmul.f32 %v472_v54, %v603_v1  ;;  %v176_v63 = vmul.f32 %v473_v55, %v603_v1  ;;  %v565_v48 = vld [vmem:[%s1023_s0 + $0xa0] sm:$0xff]   ;;  %v567_v54 = vld [vmem:[%s1023_s0 + $0xb0] sm:$0xff]  }
  0x1d   :  { %371 = vst [vmem:[%s1026_s3 + $0xb8] sm:$0xff] %v307_v51  ;;  %v177_v0 = vmul.f32 %v476_v56, %v603_v1  ;;  %v178_v2 = vmul.f32 %v477_v57, %v603_v1  ;;  %v244_v3 = vadd.f32 %v617_v7, %v173_v58  ;;  %v245_v4 = vadd.f32 %v617_v7, %v174_v59  ;;  %v568_v59 = vld [vmem:[%s1023_s0 + $0xb8] sm:$0xff]  }
  0x1e   :  { %v179_v5 = vmul.f32 %v480_v60, %v603_v1  ;;  %v180_v6 = vmul.f32 %v481_v61, %v603_v1  ;;  %v246_v8 = vadd.f32 %v617_v7, %v175_v62  ;;  %v247_v9 = vadd.f32 %v617_v7, %v176_v63 }
  0x1f   :  { %v248_v10 = vadd.f32 %v617_v7, %v177_v0  ;;  %v249_v11 = vadd.f32 %v617_v7, %v178_v2  ;;  %v308_v13 = vmax.f32 %v244_v3, 0.0  ;;  %v309_v14 = vmax.f32 %v245_v4, 0.0 }
  0x20   :  { %v250_v15 = vadd.f32 %v617_v7, %v179_v5  ;;  %v251_v16 = vadd.f32 %v617_v7, %v180_v6  ;;  %v310_v19 = vmax.f32 %v246_v8, 0.0  ;;  %v311_v20 = vmax.f32 %v247_v9, 0.0 }
  0x21   :  { %v312_v21 = vmax.f32 %v248_v10, 0.0  ;;  %v313_v22 = vmax.f32 %v249_v11, 0.0  ;;  %372 = vst [vmem:[%s1026_s3 + $0xc0] sm:$0xff] %v308_v13  ;;  %373 = vst [vmem:[%s1026_s3 + $0xc8] sm:$0xff] %v309_v14  ;;  %v484_v26 = vunpack.c.l.bf16 %v561_v12  ;;  %v485_v27 = vunpack.c.h.bf16 %v561_v12 }
  0x22   :  { %v314_v24 = vmax.f32 %v250_v15, 0.0  ;;  %v315_v25 = vmax.f32 %v251_v16, 0.0  ;;  %374 = vst [vmem:[%s1026_s3 + $0xd0] sm:$0xff] %v310_v19  ;;  %375 = vst [vmem:[%s1026_s3 + $0xd8] sm:$0xff] %v311_v20  ;;  %v488_v28 = vunpack.c.l.bf16 %v562_v17  ;;  %v489_v29 = vunpack.c.h.bf16 %v562_v17 }
  0x23   :  { %376 = vst [vmem:[%s1026_s3 + $0xe0] sm:$0xff] %v312_v21  ;;  %377 = vst [vmem:[%s1026_s3 + $0xe8] sm:$0xff] %v313_v22  ;;  %v492_v30 = vunpack.c.l.bf16 %v563_v18  ;;  %v493_v31 = vunpack.c.h.bf16 %v563_v18  ;;  %v181_v32 = vmul.f32 %v484_v26, %v603_v1  ;;  %v182_v33 = vmul.f32 %v485_v27, %v603_v1  ;;  %v569_v22 = vld [vmem:[%s1023_s0 + $0xc0] sm:$0xff]   ;;  %v570_v27 = vld [vmem:[%s1023_s0 + $0xc8] sm:$0xff]  }
  0x24   :  { %378 = vst [vmem:[%s1026_s3 + $0xf0] sm:$0xff] %v314_v24  ;;  %379 = vst [vmem:[%s1026_s3 + $0xf8] sm:$0xff] %v315_v25  ;;  %v496_v34 = vunpack.c.l.bf16 %v564_v23  ;;  %v497_v35 = vunpack.c.h.bf16 %v564_v23  ;;  %v183_v36 = vmul.f32 %v488_v28, %v603_v1  ;;  %v184_v37 = vmul.f32 %v489_v29, %v603_v1  ;;  %v571_v28 = vld [vmem:[%s1023_s0 + $0xd0] sm:$0xff]  }
  0x25   :  { %v185_v38 = vmul.f32 %v492_v30, %v603_v1  ;;  %v186_v39 = vmul.f32 %v493_v31, %v603_v1  ;;  %v252_v40 = vadd.f32 %v617_v7, %v181_v32  ;;  %v253_v41 = vadd.f32 %v617_v7, %v182_v33  ;;  %v572_v33 = vld [vmem:[%s1023_s0 + $0xd8] sm:$0xff]  }
  0x26   :  { %v187_v42 = vmul.f32 %v496_v34, %v603_v1  ;;  %v188_v43 = vmul.f32 %v497_v35, %v603_v1  ;;  %v254_v44 = vadd.f32 %v617_v7, %v183_v36  ;;  %v255_v45 = vadd.f32 %v617_v7, %v184_v37 }
  0x27   :  { %v256_v46 = vadd.f32 %v617_v7, %v185_v38  ;;  %v257_v47 = vadd.f32 %v617_v7, %v186_v39  ;;  %v316_v49 = vmax.f32 %v252_v40, 0.0  ;;  %v317_v50 = vmax.f32 %v253_v41, 0.0 }
  0x28   :  { %v258_v51 = vadd.f32 %v617_v7, %v187_v42  ;;  %v259_v52 = vadd.f32 %v617_v7, %v188_v43  ;;  %v318_v55 = vmax.f32 %v254_v44, 0.0  ;;  %v319_v56 = vmax.f32 %v255_v45, 0.0 }
  0x29   :  { %v320_v57 = vmax.f32 %v256_v46, 0.0  ;;  %v321_v58 = vmax.f32 %v257_v47, 0.0  ;;  %380 = vst [vmem:[%s1026_s3 + $0x100] sm:$0xff] %v316_v49  ;;  %381 = vst [vmem:[%s1026_s3 + $0x108] sm:$0xff] %v317_v50  ;;  %v500_v62 = vunpack.c.l.bf16 %v565_v48  ;;  %v501_v63 = vunpack.c.h.bf16 %v565_v48 }
  0x2a   :  { %v322_v60 = vmax.f32 %v258_v51, 0.0  ;;  %v323_v61 = vmax.f32 %v259_v52, 0.0  ;;  %382 = vst [vmem:[%s1026_s3 + $0x110] sm:$0xff] %v318_v55  ;;  %383 = vst [vmem:[%s1026_s3 + $0x118] sm:$0xff] %v319_v56  ;;  %v504_v0 = vunpack.c.l.bf16 %v566_v53  ;;  %v505_v2 = vunpack.c.h.bf16 %v566_v53 }
  0x2b   :  { %384 = vst [vmem:[%s1026_s3 + $0x120] sm:$0xff] %v320_v57  ;;  %385 = vst [vmem:[%s1026_s3 + $0x128] sm:$0xff] %v321_v58  ;;  %v508_v3 = vunpack.c.l.bf16 %v567_v54  ;;  %v509_v4 = vunpack.c.h.bf16 %v567_v54  ;;  %v189_v5 = vmul.f32 %v500_v62, %v603_v1  ;;  %v190_v6 = vmul.f32 %v501_v63, %v603_v1  ;;  %v573_v58 = vld [vmem:[%s1023_s0 + $0xe0] sm:$0xff]   ;;  %v574_v63 = vld [vmem:[%s1023_s0 + $0xe8] sm:$0xff]  }
  0x2c   :  { %386 = vst [vmem:[%s1026_s3 + $0x130] sm:$0xff] %v322_v60  ;;  %387 = vst [vmem:[%s1026_s3 + $0x138] sm:$0xff] %v323_v61  ;;  %v512_v8 = vunpack.c.l.bf16 %v568_v59  ;;  %v513_v9 = vunpack.c.h.bf16 %v568_v59  ;;  %v191_v10 = vmul.f32 %v504_v0, %v603_v1  ;;  %v192_v11 = vmul.f32 %v505_v2, %v603_v1  ;;  %v575_v0 = vld [vmem:[%s1023_s0 + $0xf0] sm:$0xff]  }
  0x2d   :  { %v193_v12 = vmul.f32 %v508_v3, %v603_v1  ;;  %v194_v13 = vmul.f32 %v509_v4, %v603_v1  ;;  %v260_v14 = vadd.f32 %v617_v7, %v189_v5  ;;  %v261_v15 = vadd.f32 %v617_v7, %v190_v6  ;;  %v576_v6 = vld [vmem:[%s1023_s0 + $0xf8] sm:$0xff]  }
  0x2e   :  { %v195_v16 = vmul.f32 %v512_v8, %v603_v1  ;;  %v196_v17 = vmul.f32 %v513_v9, %v603_v1  ;;  %v262_v18 = vadd.f32 %v617_v7, %v191_v10  ;;  %v263_v19 = vadd.f32 %v617_v7, %v192_v11 }
  0x2f   :  { %v264_v20 = vadd.f32 %v617_v7, %v193_v12  ;;  %v265_v21 = vadd.f32 %v617_v7, %v194_v13  ;;  %v324_v23 = vmax.f32 %v260_v14, 0.0  ;;  %v325_v24 = vmax.f32 %v261_v15, 0.0 }
  0x30   :  { %v266_v25 = vadd.f32 %v617_v7, %v195_v16  ;;  %v267_v26 = vadd.f32 %v617_v7, %v196_v17  ;;  %v326_v29 = vmax.f32 %v262_v18, 0.0  ;;  %v327_v30 = vmax.f32 %v263_v19, 0.0 }
  0x31   :  { %v328_v31 = vmax.f32 %v264_v20, 0.0  ;;  %v329_v32 = vmax.f32 %v265_v21, 0.0  ;;  %388 = vst [vmem:[%s1026_s3 + $0x140] sm:$0xff] %v324_v23  ;;  %389 = vst [vmem:[%s1026_s3 + $0x148] sm:$0xff] %v325_v24  ;;  %v516_v36 = vunpack.c.l.bf16 %v569_v22  ;;  %v517_v37 = vunpack.c.h.bf16 %v569_v22 }
  0x32   :  { %v330_v34 = vmax.f32 %v266_v25, 0.0  ;;  %v331_v35 = vmax.f32 %v267_v26, 0.0  ;;  %390 = vst [vmem:[%s1026_s3 + $0x150] sm:$0xff] %v326_v29  ;;  %391 = vst [vmem:[%s1026_s3 + $0x158] sm:$0xff] %v327_v30  ;;  %v520_v38 = vunpack.c.l.bf16 %v570_v27  ;;  %v521_v39 = vunpack.c.h.bf16 %v570_v27 }
  0x33   :  { %392 = vst [vmem:[%s1026_s3 + $0x160] sm:$0xff] %v328_v31  ;;  %393 = vst [vmem:[%s1026_s3 + $0x168] sm:$0xff] %v329_v32  ;;  %v524_v40 = vunpack.c.l.bf16 %v571_v28  ;;  %v525_v41 = vunpack.c.h.bf16 %v571_v28  ;;  %v197_v42 = vmul.f32 %v516_v36, %v603_v1  ;;  %v198_v43 = vmul.f32 %v517_v37, %v603_v1 }
  0x34   :  { %394 = vst [vmem:[%s1026_s3 + $0x170] sm:$0xff] %v330_v34  ;;  %395 = vst [vmem:[%s1026_s3 + $0x178] sm:$0xff] %v331_v35  ;;  %v528_v44 = vunpack.c.l.bf16 %v572_v33  ;;  %v529_v45 = vunpack.c.h.bf16 %v572_v33  ;;  %v199_v46 = vmul.f32 %v520_v38, %v603_v1  ;;  %v200_v47 = vmul.f32 %v521_v39, %v603_v1 }
  0x35   :  { %v201_v48 = vmul.f32 %v524_v40, %v603_v1  ;;  %v202_v49 = vmul.f32 %v525_v41, %v603_v1  ;;  %v268_v50 = vadd.f32 %v617_v7, %v197_v42  ;;  %v269_v51 = vadd.f32 %v617_v7, %v198_v43 }
  0x36   :  { %v203_v52 = vmul.f32 %v528_v44, %v603_v1  ;;  %v204_v53 = vmul.f32 %v529_v45, %v603_v1  ;;  %v270_v54 = vadd.f32 %v617_v7, %v199_v46  ;;  %v271_v55 = vadd.f32 %v617_v7, %v200_v47 }
  0x37   :  { %v272_v56 = vadd.f32 %v617_v7, %v201_v48  ;;  %v273_v57 = vadd.f32 %v617_v7, %v202_v49  ;;  %v332_v59 = vmax.f32 %v268_v50, 0.0  ;;  %v333_v60 = vmax.f32 %v269_v51, 0.0 }
  0x38   :  { %v274_v61 = vadd.f32 %v617_v7, %v203_v52  ;;  %v275_v62 = vadd.f32 %v617_v7, %v204_v53  ;;  %v334_v2 = vmax.f32 %v270_v54, 0.0  ;;  %v335_v3 = vmax.f32 %v271_v55, 0.0 }
  0x39   :  { %v336_v4 = vmax.f32 %v272_v56, 0.0  ;;  %v337_v5 = vmax.f32 %v273_v57, 0.0  ;;  %396 = vst [vmem:[%s1026_s3 + $0x180] sm:$0xff] %v332_v59  ;;  %397 = vst [vmem:[%s1026_s3 + $0x188] sm:$0xff] %v333_v60  ;;  %v532_v10 = vunpack.c.l.bf16 %v573_v58  ;;  %v533_v11 = vunpack.c.h.bf16 %v573_v58 }
  0x3a   :  { %v338_v8 = vmax.f32 %v274_v61, 0.0  ;;  %v339_v9 = vmax.f32 %v275_v62, 0.0  ;;  %398 = vst [vmem:[%s1026_s3 + $0x190] sm:$0xff] %v334_v2  ;;  %399 = vst [vmem:[%s1026_s3 + $0x198] sm:$0xff] %v335_v3  ;;  %v536_v12 = vunpack.c.l.bf16 %v574_v63  ;;  %v537_v13 = vunpack.c.h.bf16 %v574_v63 }
  0x3b   :  { %400 = vst [vmem:[%s1026_s3 + $0x1a0] sm:$0xff] %v336_v4  ;;  %401 = vst [vmem:[%s1026_s3 + $0x1a8] sm:$0xff] %v337_v5  ;;  %v540_v14 = vunpack.c.l.bf16 %v575_v0  ;;  %v541_v15 = vunpack.c.h.bf16 %v575_v0  ;;  %v205_v16 = vmul.f32 %v532_v10, %v603_v1  ;;  %v206_v17 = vmul.f32 %v533_v11, %v603_v1 }
  0x3c   :  { %402 = vst [vmem:[%s1026_s3 + $0x1b0] sm:$0xff] %v338_v8  ;;  %403 = vst [vmem:[%s1026_s3 + $0x1b8] sm:$0xff] %v339_v9  ;;  %v544_v18 = vunpack.c.l.bf16 %v576_v6  ;;  %v545_v19 = vunpack.c.h.bf16 %v576_v6  ;;  %v207_v20 = vmul.f32 %v536_v12, %v603_v1  ;;  %v208_v21 = vmul.f32 %v537_v13, %v603_v1 }
  0x3d   :  { %v209_v22 = vmul.f32 %v540_v14, %v603_v1  ;;  %v210_v23 = vmul.f32 %v541_v15, %v603_v1  ;;  %v276_v24 = vadd.f32 %v617_v7, %v205_v16  ;;  %v277_v25 = vadd.f32 %v617_v7, %v206_v17 }
  0x3e   :  { %v211_v26 = vmul.f32 %v544_v18, %v603_v1  ;;  %v212_v27 = vmul.f32 %v545_v19, %v603_v1  ;;  %v278_v28 = vadd.f32 %v617_v7, %v207_v20  ;;  %v279_v29 = vadd.f32 %v617_v7, %v208_v21 }
  0x3f   :  { %v280_v30 = vadd.f32 %v617_v7, %v209_v22  ;;  %v281_v31 = vadd.f32 %v617_v7, %v210_v23  ;;  %v340_v32 = vmax.f32 %v276_v24, 0.0  ;;  %v341_v33 = vmax.f32 %v277_v25, 0.0 }
  0x40   :  { %v282_v34 = vadd.f32 %v617_v7, %v211_v26  ;;  %v283_v35 = vadd.f32 %v617_v7, %v212_v27  ;;  %v342_v36 = vmax.f32 %v278_v28, 0.0  ;;  %v343_v37 = vmax.f32 %v279_v29, 0.0 }
  0x41   :  { %v344_v38 = vmax.f32 %v280_v30, 0.0  ;;  %v345_v39 = vmax.f32 %v281_v31, 0.0  ;;  %404 = vst [vmem:[%s1026_s3 + $0x1c0] sm:$0xff] %v340_v32  ;;  %405 = vst [vmem:[%s1026_s3 + $0x1c8] sm:$0xff] %v341_v33 }
  0x42   :  { %v346_v1 = vmax.f32 %v282_v34, 0.0  ;;  %v347_v40 = vmax.f32 %v283_v35, 0.0  ;;  %406 = vst [vmem:[%s1026_s3 + $0x1d0] sm:$0xff] %v342_v36  ;;  %407 = vst [vmem:[%s1026_s3 + $0x1d8] sm:$0xff] %v343_v37 }
  0x43   :  { %408 = vst [vmem:[%s1026_s3 + $0x1e0] sm:$0xff] %v344_v38  ;;  %409 = vst [vmem:[%s1026_s3 + $0x1e8] sm:$0xff] %v345_v39 }
  0x44   :  { %410 = vst [vmem:[%s1026_s3 + $0x1f0] sm:$0xff] %v346_v1  ;;  %411 = vst [vmem:[%s1026_s3 + $0x1f8] sm:$0xff] %v347_v40 }

// kernel: conv_block.2
= control target key start
LH: loop header
LB: loop body
LE: loop exit
PB: predicated region body
PF: predicated region fallthrough
CT: control target
= control target key end

     0   :  { %s4507_s15 = smov 0   ;;  %s5561_s0 = inlined_call_operand.vmem [shape: bf16[2,18,18,8], index: 0, kind: input, shape index: {}]   ;;  %s5562_s1 = inlined_call_operand.vmem [shape: bf16[9,8,128], index: 1, kind: input, shape index: {}]   ;;  %s5563_s2 = inlined_call_operand.vmem [shape: f32[1,128], index: 2, kind: input, shape index: {}]   ;;  %s5564_s3 = inlined_call_operand.vmem [shape: bf16[512,128], index: 3, kind: output, shape index: {0}]   ;;  %s5565_s4 = inlined_call_operand.vmem [shape: f32[2,2,128], index: 4, kind: output, shape index: {1}]  }
   0x1 LB: > { %s4513_s16 = sadd.s32 4294967295, %s4480_s15   ;;  %p3325_p0 = scmp.ge.s32.totalorder %s4480_s15, 1  ;;  %s4480_s15 = sphi %s4507_s15, %s15_s15  }
   0x2   : > { %p165_p1 = scmp.lt.s32.totalorder %s4480_s15, 3 }
   0x4   : > { %p166_p2 = pnand %p3325_p0, %p165_p1 }
   0x6   : > { %169 = sbr.rel (%p166_p2) target bundleno = 573 (0x23d), region = 32 }
   0xd   : > { %v3330_v0 = vld [vmem:[%s5562_s1 + $0x4] sm:$0xf]  ;;  %vm752_vm0 = vcmask 1043456   ;;  %v3462_v1 = vld [vmem:[%s5562_s1 + $0x10] sm:$0xf]  ;;  %p195_p3 = scmp.lt.s32.totalorder %s4513_s16, 1 }
   0xe   : > { %4433 = vmatprep.subr.msk.bf16.mxu1 %vm752_vm0, %v3330_v0  ;;  %4437 = vmatprep.subr.msk.bf16.mxu0 %vm752_vm0, %v3462_v1  ;;  %v754_v2 = vsel %vm752_vm0, %v3330_v0, 0  ;;  %v4528_v3 = vsel %vm752_vm0, %v3462_v1, 0  ;;  %v265_v4 = vld [vmem:[%s5562_s1] sm:$0xf]  ;;  %v3481_v5 = vld [vmem:[%s5562_s1 + $0x14] sm:$0xf] }
   0xf   : > { %5597 = vst [vmem:[#allocation2_spill] sm:$0xff] %v4528_v3  ;;  %3870 = vmatpush3.bf16.msra.mxu1 %v754_v2  ;;  %4006 = vmatpush3.bf16.msra.mxu0 %v4528_v3  ;;  %s4532_s21 = scalar_select %p195_p3, %s4513_s16, 1  ;;  %vm266_vm1 = vsmask.f32 3328  ;;  %vm267_vm2 = vsmask.f32 7440 }
  0x10   : > { %4434 = vmatprep.subr.msk.bf16.mxu1 %vm752_vm0, %v265_v4  ;;  %4439 = vmatprep.subr.msk.bf16.mxu0 %vm752_vm0, %v3481_v5  ;;  %v4549_v6 = vsel %vm752_vm0, %v265_v4, 0  ;;  %v4552_v7 = vsel %vm752_vm0, %v3481_v5, 0  ;;  %v4557_v8 = vld [vmem:[%s5562_s1 + $0x18] sm:$0xf]  ;;  %vm703_vm3 = vcmask 64512   ;;  %vm4593_vm4 = vmor %vm266_vm1, %vm267_vm2  ;;  %vm1225_vm5 = vcmask 1042432  }
  0x11   : > { %s4443_s26 = smul.u32 216, %s4532_s21  ;;  %v4581_v20 = vsel %vm752_vm0, %v4557_v8, 0  ;;  %vm1226_vm6 = vcmask 1046532   ;;  %s3327_s18 = sshll.u32 %s4513_s16, 5  ;;  %vm3231_vm8 = vcmask 1040384  }
  0x12   : > { %vm4774_vm7 = vmor %vm1225_vm5, %vm1226_vm6  ;;  %p201_p4 = scmp.lt.s32.totalorder %s3327_s18, 63  ;;  %s3329_s25 = sshll.u32 %s4532_s21, 1 }
  0x13   : > { %s4546_s29 = scalar_lea.vmem %s5561_s0, %s4443_s26  ;;  %s209_s28 = scalar_lea.vmem %s5565_s4, %s3329_s25 }
  0x14   : > { %v4560_v9 = vld [vmem:[%s4546_s29] sm:$0xf]  ;;  %v4563_v10 = vld [vmem:[%s4546_s29 + $0x4] sm:$0xf]  ;;  %v213_v11 = vld [vmem:[%s4546_s29 + $0x8] sm:$0x1] }
  0x15   : > { %v270_v12 = vshrl.u32 %v4560_v9, 16  ;;  %v273_v13 = vshll.u32 %v4560_v9, 16  ;;  %v279_v14 = vshll.u32 %v4563_v10, 16  ;;  %v283_v15 = vshrl.u32 %v4563_v10, 16  ;;  %v4571_v16 = vld [vmem:[%s4546_s29 + $0xc] sm:$0xf] }
  0x16   : > { %v289_v17 = vshll.u32 %v213_v11, 16  ;;  %v4574_v18 = vld [vmem:[%s4546_s29 + $0x10] sm:$0xf]  ;;  %v4577_v19 = vld [vmem:[%s4546_s29 + $0x14] sm:$0x1]  ;;  %v294_v26 = vshrl.u32 %v4571_v16, 16 }
  0x17   : > { %v272_v21 = vrot.slane %v270_v12, 4  ;;  %v275_v22 = vrot.slane %v273_v13, 5  ;;  %v281_v23 = vrot.slane %v279_v14, 5  ;;  %v285_v24 = vrot.slane %v283_v15, 4  ;;  %v4589_v33 = vld [vmem:[%s4546_s29 + $0x18] sm:$0xf] }
  0x18   : > { %v291_v25 = vrot.slane %v289_v17, 5  ;;  %v297_v27 = vshll.u32 %v4571_v16, 16  ;;  %v303_v28 = vshll.u32 %v4574_v18, 16  ;;  %v307_v31 = vshrl.u32 %v4574_v18, 16  ;;  %v4602_v39 = vld [vmem:[%s4546_s29 + $0x1c] sm:$0xf] }
  0x19   : > { %v276_v29 = vor.u32 %v275_v22, %v272_v21  ;;  %v286_v30 = vor.u32 %v285_v24, %v281_v23  ;;  %v313_v32 = vshll.u32 %v4577_v19, 16  ;;  %v296_v35 = vrot.slane %v294_v26, 4  ;;  %v4606_v46 = vld [vmem:[%s4546_s29 + $0x20] sm:$0x1]  ;;  %v4616_v57 = vld [vmem:[%s4546_s29 + $0x24] sm:$0xf] }
  0x1a   : > { %v299_v36 = vrot.slane %v297_v27, 5  ;;  %v305_v37 = vrot.slane %v303_v28, 5  ;;  %v4599_v38 = vcombine.low %v4571_v16, %v4574_v18  ;;  %v309_v42 = vrot.slane %v307_v31, 4  ;;  %v4621_v62 = vld [vmem:[%s4546_s29 + $0x28] sm:$0xf]  ;;  %s5644_s18 = smov (!%p201_p4, %s3327_s18), 63 }
  0x1b   : > { %v277_v40 = vrot.slane %v276_v29, 4  ;;  %v287_v41 = vrot.slane %v286_v30, 4  ;;  %v315_v43 = vrot.slane %v313_v32, 5  ;;  %v1240_v45 = vrot.slane %v4577_v19, 5  ;;  %v4629_v4 = vld [vmem:[%s4546_s29 + $0x2c] sm:$0x1] }
  0x1c   : > { %v300_v44 = vor.u32 %v299_v36, %v296_v35  ;;  %v318_v47 = vshrl.u32 %v4589_v33, 16  ;;  %v321_v48 = vshll.u32 %v4589_v33, 16  ;;  %v310_v51 = vor.u32 %v309_v42, %v305_v37  ;;  %v4635_v14 = vld [vmem:[%s4546_s29 + $0x30] sm:$0xf]  ;;  %v4647_v28 = vld [vmem:[%s4546_s29 + $0x34] sm:$0xf] }
  0x1d   : > { %v282_v49 = vsel %vm4593_vm4, %v277_v40, %v281_v23  ;;  %v292_v50 = vsel %vm4593_vm4, %v287_v41, %v291_v25  ;;  %v327_v52 = vshll.u32 %v4602_v39, 16  ;;  %v331_v60 = vshrl.u32 %v4602_v39, 16  ;;  %v4642_v23 = vld [vmem:[%s5562_s1 + $0x8] sm:$0xf]  ;;  %v4654_v32 = vld [vmem:[%s4546_s29 + $0x38] sm:$0x1] }
  0x1e   : > { %v3331_v53 = vcombine.low %v282_v49, %v292_v50  ;;  %v301_v54 = vrot.slane %v300_v44, 4  ;;  %v320_v55 = vrot.slane %v318_v47, 4  ;;  %v323_v56 = vrot.slane %v321_v48, 5  ;;  %v4662_v48 = vld [vmem:[%s4546_s29 + $0x3c] sm:$0xf]  ;;  %s3328_s22 = sshll.u32 %s5644_s18, 2 }
  0x1f   : > { %v311_v58 = vrot.slane %v310_v51, 4  ;;  %v329_v59 = vrot.slane %v327_v52, 5  ;;  %v337_v61 = vshll.u32 %v4606_v46, 16  ;;  %v1244_v1 = vrot.slane %v4602_v39, 5  ;;  %v4670_v52 = vld [vmem:[%s4546_s29 + $0x40] sm:$0xf]  ;;  %s5500_s24 = scalar_lea.vmem %s5564_s3, %s3328_s22 }
  0x20   : > { %3871 = vmatprep.mubr.msk.bf16.mxu1 %vm703_vm3, %v3331_v53  ;;  %v306_v63 = vsel %vm4593_vm4, %v301_v54, %v305_v37  ;;  %v324_v0 = vor.u32 %v323_v56, %v320_v55  ;;  %v1247_v2 = vrot.slane %v4606_v46, 5  ;;  %v333_v11 = vrot.slane %v331_v60, 4 }
  0x21   : > { %v316_v5 = vsel %vm4593_vm4, %v311_v58, %v315_v43  ;;  %v339_v12 = vrot.slane %v337_v61, 5  ;;  %v342_v13 = vshrl.u32 %v4616_v57, 16  ;;  %v345_v21 = vshll.u32 %v4616_v57, 16 }
  0x22   : > { %v3332_v15 = vcombine.low %v306_v63, %v316_v5  ;;  %v325_v17 = vrot.slane %v324_v0, 4  ;;  %v351_v22 = vshll.u32 %v4621_v62, 16  ;;  %v334_v24 = vor.u32 %v333_v11, %v329_v59  ;;  %v4682_v5 = vld [vmem:[%s4546_s29 + $0x44] sm:$0x1] }
  0x23   : > { %v344_v25 = vrot.slane %v342_v13, 4  ;;  %v355_v26 = vshrl.u32 %v4621_v62, 16  ;;  %v361_v27 = vshll.u32 %v4629_v4, 16  ;;  %v347_v30 = vrot.slane %v345_v21, 5  ;;  %v4687_v13 = vld [vmem:[%s4546_s29 + $0x48] sm:$0xf] }
  0x24   : > { %4007 = vmatprep.mubr.msk.bf16.mxu0 %vm703_vm3, %v3332_v15  ;;  %3872 = vmatmul.mubr.msk.bf16.vlgmr.msra.gmra.mrb[0].mxu1 %vm703_vm3, %v3332_v15  ;;  %v330_v29 = vsel %vm4593_vm4, %v325_v17, %v329_v59  ;;  %v353_v31 = vrot.slane %v351_v22, 5  ;;  %v366_v35 = vshrl.u32 %v4635_v14, 16  ;;  %v335_v36 = vrot.slane %v334_v24, 4  ;;  %v4694_v24 = vld [vmem:[%s4546_s29 + $0x4c] sm:$0xf] }
  0x25   : > { %3904 = vmatpush3.bf16.msra.mxu1 %v4549_v6  ;;  %v357_v37 = vrot.slane %v355_v26, 4  ;;  %v363_v40 = vrot.slane %v361_v27, 5  ;;  %v369_v41 = vshll.u32 %v4635_v14, 16  ;;  %v348_v42 = vor.u32 %v347_v30, %v344_v25 }
  0x26   : > { %v368_v43 = vrot.slane %v366_v35, 4  ;;  %v375_v44 = vshll.u32 %v4647_v28, 16  ;;  %v379_v47 = vshrl.u32 %v4647_v28, 16  ;;  %4435 = vmatprep.subr.msk.bf16.mxu1 %vm752_vm0, %v4642_v23  ;;  %v340_v49 = vsel %vm4593_vm4, %v335_v36, %v339_v12 }
  0x27   : > { %v358_v6 = vor.u32 %v357_v37, %v353_v31  ;;  %v371_v50 = vrot.slane %v369_v41, 5  ;;  %v385_v51 = vshll.u32 %v4654_v32, 16  ;;  %v4672_v53 = vcombine.low %v330_v29, %v340_v49 }
  0x28   : > { %v349_v54 = vrot.slane %v348_v42, 4  ;;  %v377_v55 = vrot.slane %v375_v44, 5  ;;  %v381_v56 = vrot.slane %v379_v47, 4  ;;  %v390_v61 = vshrl.u32 %v4662_v48, 16  ;;  %v4716_v42 = vld [vmem:[%s4546_s29 + $0x54] sm:$0xf] }
  0x29   : > { %5600 = vst [vmem:[#allocation3_spill] sm:$0xff] %v4672_v53  ;;  %v359_v58 = vrot.slane %v358_v6, 4  ;;  %v372_v59 = vor.u32 %v371_v50, %v368_v43  ;;  %v387_v60 = vrot.slane %v385_v51, 5  ;;  %4008 = vmatmul.mubr.msk.bf16.vlgmr.msra.gmra.mrb[0].mxu0 %vm703_vm3, %v4672_v53  ;;  %3875 = vmatprep.mubr.msk.bf16.mxu1 %vm703_vm3, %v4672_v53  ;;  %v393_v11 = vshll.u32 %v4662_v48, 16  ;;  %5602 = vst [vmem:[#allocation5_spill] sm:$0xff] %v4716_v42 }
  0x2a   : > { %v354_v63 = vsel %vm4593_vm4, %v349_v54, %v353_v31  ;;  %v382_v0 = vor.u32 %v381_v56, %v377_v55  ;;  %v399_v12 = vshll.u32 %v4670_v52, 16  ;;  %4040 = vmatpush3.bf16.msra.mxu0 %v4552_v7  ;;  %v392_v21 = vrot.slane %v390_v61, 4  ;;  %v4721_v6 = vld [vmem:[%s4546_s29 + $0x58] sm:$0xf] }
  0x2b   : > { %v364_v15 = vsel %vm4593_vm4, %v359_v58, %v363_v40  ;;  %v373_v17 = vrot.slane %v372_v59, 4  ;;  %v403_v22 = vshrl.u32 %v4670_v52, 16  ;;  %v395_v27 = vrot.slane %v393_v11, 5  ;;  %4440 = vmatprep.subr.msk.bf16.mxu0 %vm752_vm0, %v4557_v8  ;;  %v4711_v8 = vld [vmem:[%s4546_s29 + $0x50] sm:$0x1] }
  0x2c   : > { %v4696_v25 = vcombine.low %v354_v63, %v364_v15  ;;  %v383_v26 = vrot.slane %v382_v0, 4  ;;  %v401_v29 = vrot.slane %v399_v12, 5  ;;  %v409_v31 = vshll.u32 %v4682_v5, 16  ;;  %v4734_v11 = vld [vmem:[%s4546_s29 + $0x5c] sm:$0x1] }
  0x2d   : > { %v378_v7 = vsel %vm4593_vm4, %v373_v17, %v377_v55  ;;  %v405_v30 = vrot.slane %v403_v22, 4  ;;  %v414_v35 = vshrl.u32 %v4687_v13, 16  ;;  %v396_v37 = vor.u32 %v395_v27, %v392_v21  ;;  %v4738_v15 = vld [vmem:[%s4546_s29 + $0x60] sm:$0xf]  ;;  %v4743_v27 = vld [vmem:[%s4546_s29 + $0x64] sm:$0xf] }
  0x2e   : > { %5601 = vst [vmem:[#allocation4_spill] sm:$0xff] %v4696_v25  ;;  %4011 = vmatprep.mubr.msk.bf16.mxu0 %vm703_vm3, %v4696_v25  ;;  %3876 = vmatmul.mubr.msk.bf16.gmra.mrb[4].mxu1 %vm703_vm3, %v4696_v25  ;;  %v388_v36 = vsel %vm4593_vm4, %v383_v26, %v387_v60  ;;  %v417_v40 = vshll.u32 %v4687_v13, 16  ;;  %v423_v41 = vshll.u32 %v4694_v24, 16  ;;  %v411_v47 = vrot.slane %v409_v31, 5  ;;  %v4955_v25 = vld [vmem:[%s4546_s29 + $0xa8] sm:$0xf] }
  0x2f   : > { %v4718_v43 = vcombine.low %v378_v7, %v388_v36  ;;  %v406_v44 = vor.u32 %v405_v30, %v401_v29  ;;  %v416_v49 = vrot.slane %v414_v35, 4  ;;  %v397_v50 = vrot.slane %v396_v37, 4 }
  0x30   : > { %v419_v51 = vrot.slane %v417_v40, 5  ;;  %v425_v54 = vrot.slane %v423_v41, 5  ;;  %v427_v55 = vshrl.u32 %v4694_v24, 16  ;;  %v433_v58 = vshll.u32 %v4711_v8, 16 }
  0x31   : > { %5603 = vst [vmem:[#allocation6_spill] sm:$0xff] %v4718_v43  ;;  %3879 = vmatprep.mubr.msk.bf16.mxu1 %vm703_vm3, %v4718_v43  ;;  %v407_v56 = vrot.slane %v406_v44, 4  ;;  %v438_v59 = vshrl.u32 %v4716_v42, 16  ;;  %v441_v60 = vshll.u32 %v4716_v42, 16  ;;  %4012 = vmatmul.mubr.msk.bf16.gmra.mrb[4].mxu0 %vm703_vm3, %v4718_v43  ;;  %v402_v61 = vsel %vm4593_vm4, %v397_v50, %v401_v29 }
  0x32   : > { %v420_v63 = vor.u32 %v419_v51, %v416_v49  ;;  %v429_v0 = vrot.slane %v427_v55, 4  ;;  %v447_v12 = vshll.u32 %v4721_v6, 16  ;;  %v435_v21 = vrot.slane %v433_v58, 5 }
  0x33   : > { %v412_v17 = vsel %vm4593_vm4, %v407_v56, %v411_v47  ;;  %v440_v22 = vrot.slane %v438_v59, 4  ;;  %v443_v26 = vrot.slane %v441_v60, 5  ;;  %v451_v36 = vshrl.u32 %v4721_v6, 16  ;;  %v4757_v47 = vld [vmem:[%s4546_s29 + $0x68] sm:$0x1] }
  0x34   : > { %v4745_v7 = vcombine.low %v402_v61, %v412_v17  ;;  %v421_v29 = vrot.slane %v420_v63, 4  ;;  %v430_v30 = vor.u32 %v429_v0, %v425_v54  ;;  %v449_v31 = vrot.slane %v447_v12, 5 }
  0x35   : > { %v444_v35 = vor.u32 %v443_v26, %v440_v22  ;;  %v457_v37 = vshll.u32 %v4734_v11, 16  ;;  %v462_v40 = vshrl.u32 %v4738_v15, 16  ;;  %v465_v49 = vshll.u32 %v4738_v15, 16 }
  0x36   : > { %5604 = vst [vmem:[#allocation7_spill] sm:$0xff] %v4745_v7  ;;  %4015 = vmatprep.mubr.msk.bf16.mxu0 %vm703_vm3, %v4745_v7  ;;  %3880 = vmatmul.mubr.msk.bf16.gmra.mrb[8].mxu1 %vm703_vm3, %v4745_v7  ;;  %v426_v41 = vsel %vm4593_vm4, %v421_v29, %v425_v54  ;;  %v431_v44 = vrot.slane %v430_v30, 4  ;;  %v471_v50 = vshll.u32 %v4743_v27, 16  ;;  %v453_v55 = vrot.slane %v451_v36, 4  ;;  %v4765_v54 = vld [vmem:[%s4546_s29 + $0x6c] sm:$0xf] }
  0x37   : > { %v445_v51 = vrot.slane %v444_v35, 4  ;;  %v459_v56 = vrot.slane %v457_v37, 5  ;;  %v464_v58 = vrot.slane %v462_v40, 4  ;;  %v467_v60 = vrot.slane %v465_v49, 5  ;;  %v4781_v36 = vld [vmem:[%s4546_s29 + $0x70] sm:$0xf] }
  0x38   : > { %v436_v59 = vsel %vm4593_vm4, %v431_v44, %v435_v21  ;;  %v473_v61 = vrot.slane %v471_v50, 5  ;;  %v475_v63 = vshrl.u32 %v4743_v27, 16  ;;  %v454_v17 = vor.u32 %v453_v55, %v449_v31  ;;  %v4932_v7 = vld [vmem:[%s4546_s29 + $0xa0] sm:$0xf] }
  0x39   : > { %v4767_v0 = vcombine.low %v426_v41, %v436_v59  ;;  %v450_v12 = vsel %vm4593_vm4, %v445_v51, %v449_v31  ;;  %v481_v22 = vshll.u32 %v4757_v47, 16  ;;  %v468_v21 = vor.u32 %v467_v60, %v464_v58  ;;  %v4794_v51 = vld [vmem:[%s4546_s29 + $0x74] sm:$0x1] }
  0x3a   : > { %v477_v29 = vrot.slane %v475_v63, 4  ;;  %v3396_v30 = vrot.slane %v4571_v16, 9  ;;  %v1237_v35 = vrot.slane %v4574_v18, 5  ;;  %v455_v31 = vrot.slane %v454_v17, 4 }
  0x3b   : > { %5605 = vst [vmem:[#allocation8_spill] sm:$0xff] %v4767_v0  ;;  %4016 = vmatmul.mubr.msk.bf16.gmra.mrb[8].mxu0 %vm703_vm3, %v4767_v0  ;;  %3883 = vmatprep.mubr.msk.bf16.mxu1 %vm703_vm3, %v4767_v0  ;;  %v483_v37 = vrot.slane %v481_v22, 5  ;;  %v486_v40 = vshrl.u32 %v4765_v54, 16  ;;  %v489_v41 = vshll.u32 %v4765_v54, 16  ;;  %v469_v44 = vrot.slane %v468_v21, 4 }
  0x3c   : > { %v478_v49 = vor.u32 %v477_v29, %v473_v61  ;;  %v1238_v16 = vsel %vm4774_vm7, %v3396_v30, %v1237_v35  ;;  %v1239_v18 = vrot.slane %v1237_v35, 4  ;;  %v460_v50 = vsel %vm4593_vm4, %v455_v31, %v459_v56  ;;  %v4806_v56 = vld [vmem:[%s4546_s29 + $0x78] sm:$0xf]  ;;  %v4822_v31 = vld [vmem:[%s4546_s29 + $0x7c] sm:$0xf] }
  0x3d   : > { %v488_v55 = vrot.slane %v486_v40, 4  ;;  %v491_v58 = vrot.slane %v489_v41, 5  ;;  %v495_v59 = vshll.u32 %v4781_v36, 16  ;;  %v4797_v60 = vcombine.low %v450_v12, %v460_v50 }
  0x3e   : > { %v474_v63 = vsel %vm4593_vm4, %v469_v44, %v473_v61  ;;  %v479_v17 = vrot.slane %v478_v49, 4  ;;  %v1241_v22 = vsel %vm4774_vm7, %v1239_v18, %v1240_v45  ;;  %v499_v35 = vshrl.u32 %v4781_v36, 16  ;;  %v4827_v49 = vld [vmem:[%s4546_s29 + $0x80] sm:$0x1] }
  0x3f   : > { %5608 = vst [vmem:[#allocation9_spill] sm:$0xff] %v4797_v60  ;;  %v4808_v21 = vcombine.low %v1238_v16, %v1241_v22  ;;  %v492_v29 = vor.u32 %v491_v58, %v488_v55  ;;  %v497_v30 = vrot.slane %v495_v59, 5  ;;  %4019 = vmatprep.mubr.msk.bf16.mxu0 %vm703_vm3, %v4797_v60  ;;  %3884 = vmatmul.mubr.msk.bf16.gmra.mrb[12].mxu1 %vm703_vm3, %v4797_v60  ;;  %v505_v45 = vshll.u32 %v4794_v51, 16  ;;  %v4925_v60 = vld [vmem:[%s4546_s29 + $0x9c] sm:$0xf] }
  0x40   : > { %v484_v19 = vsel %vm4593_vm4, %v479_v17, %v483_v37  ;;  %v3397_v61 = vrot.slane %v4589_v33, 9  ;;  %v1246_v12 = vrot.slane %v1244_v1, 4  ;;  %v501_v44 = vrot.slane %v499_v35, 4 }
  0x41   : > { %5609 = vst [vmem:[#allocation10_spill] sm:$0xff] %v4808_v21  ;;  %v4824_v40 = vcombine.low %v474_v63, %v484_v19  ;;  %v493_v41 = vrot.slane %v492_v29, 4  ;;  %v510_v16 = vshrl.u32 %v4806_v56, 16  ;;  %v507_v18 = vrot.slane %v505_v45, 5  ;;  %v4853_v29 = vld [vmem:[%s4546_s29 + $0x84] sm:$0xf] }
  0x42   : > { %v1245_v37 = vsel %vm4774_vm7, %v3397_v61, %v1244_v1  ;;  %v1248_v50 = vsel %vm4774_vm7, %v1246_v12, %v1247_v2  ;;  %v513_v55 = vshll.u32 %v4806_v56, 16  ;;  %v502_v59 = vor.u32 %v501_v44, %v497_v30 }
  0x43   : > { %5610 = vst [vmem:[#allocation11_spill] sm:$0xff] %v4824_v40  ;;  %4020 = vmatmul.mubr.msk.bf16.gmra.mrb[12].mxu0 %vm703_vm3, %v4824_v40  ;;  %3887 = vmatprep.mubr.msk.bf16.mxu1 %vm703_vm3, %v4824_v40  ;;  %v498_v58 = vsel %vm4593_vm4, %v493_v41, %v497_v30  ;;  %v4845_v63 = vcombine.low %v1245_v37, %v1248_v50  ;;  %v512_v1 = vrot.slane %v510_v16, 4  ;;  %v519_v2 = vshll.u32 %v4822_v31, 16  ;;  %v4859_v16 = vld [vmem:[%s4546_s29 + $0x88] sm:$0xf] }
  0x44   : > { %4041 = vmatprep.mubr.msk.bf16.mxu0 %vm703_vm3, %v4808_v21  ;;  %v515_v46 = vrot.slane %v513_v55, 5  ;;  %v523_v17 = vshrl.u32 %v4822_v31, 16  ;;  %v529_v22 = vshll.u32 %v4827_v49, 16  ;;  %v503_v35 = vrot.slane %v502_v59, 4 }
  0x45   : > { %5611 = vst [vmem:[#allocation12_spill] sm:$0xff] %v4845_v63  ;;  %v3398_v30 = vrot.slane %v4616_v57, 9  ;;  %v1251_v19 = vrot.slane %v4621_v62, 5  ;;  %v1254_v45 = vrot.slane %v4629_v4, 5  ;;  %v521_v12 = vrot.slane %v519_v2, 5 }
  0x46   : > { %v516_v61 = vor.u32 %v515_v46, %v512_v1  ;;  %v525_v41 = vrot.slane %v523_v17, 4  ;;  %v531_v44 = vrot.slane %v529_v22, 5  ;;  %v508_v37 = vsel %vm4593_vm4, %v503_v35, %v507_v18  ;;  %v4869_v1 = vld [vmem:[%s4546_s29 + $0x8c] sm:$0x1] }
  0x47   : > { %v1252_v50 = vsel %vm4774_vm7, %v3398_v30, %v1251_v19  ;;  %v1253_v55 = vrot.slane %v1251_v19, 4  ;;  %v534_v59 = vshrl.u32 %v4853_v29, 16  ;;  %v4866_v3 = vcombine.low %v498_v58, %v508_v37 }
  0x48   : > { %v517_v40 = vrot.slane %v516_v61, 4  ;;  %v526_v4 = vor.u32 %v525_v41, %v521_v12  ;;  %v537_v46 = vshll.u32 %v4853_v29, 16  ;;  %v543_v18 = vshll.u32 %v4859_v16, 16  ;;  %v4883_v61 = vld [vmem:[%s4546_s29 + $0x90] sm:$0xf] }
  0x49   : > { %5612 = vst [vmem:[#allocation13_spill] sm:$0xff] %v4866_v3  ;;  %v1255_v2 = vsel %vm4774_vm7, %v1253_v55, %v1254_v45  ;;  %v536_v17 = vrot.slane %v534_v59, 4  ;;  %v547_v22 = vshrl.u32 %v4859_v16, 16  ;;  %3888 = vmatmul.mubr.msk.bf16.gmra.mrb[16].mxu1 %vm703_vm3, %v4866_v3  ;;  %v4888_v45 = vld [vmem:[%s5562_s1 + $0x1c] sm:$0xf]  ;;  %v1258_v59 = vrot.slane %v4647_v28, 5 }
  0x4a   : > { %v522_v58 = vsel %vm4593_vm4, %v517_v40, %v521_v12  ;;  %v527_v35 = vrot.slane %v526_v4, 4  ;;  %v4880_v30 = vcombine.low %v1252_v50, %v1255_v2  ;;  %v539_v19 = vrot.slane %v537_v46, 5  ;;  %5614 = vst [vmem:[#allocation15_spill] sm:$0xff] %v4888_v45  ;;  %v4902_v46 = vld [vmem:[%s4546_s29 + $0x94] sm:$0xf] }
  0x4b   : > { %4042 = vmatmul.mubr.msk.bf16.vlgmr.msra.gmra.mrb[0].mxu0 %vm703_vm3, %v4845_v63  ;;  %v545_v41 = vrot.slane %v543_v18, 5  ;;  %v549_v37 = vrot.slane %v547_v22, 4  ;;  %v553_v40 = vshll.u32 %v4869_v1, 16  ;;  %v3399_v12 = vrot.slane %v4635_v14, 9  ;;  %v4907_v3 = vld [vmem:[%s4546_s29 + $0x98] sm:$0x1] }
  0x4c   : > { %5613 = vst [vmem:[#allocation14_spill] sm:$0xff] %v4880_v30  ;;  %4074 = vmatpush3.bf16.msra.mxu0 %v4581_v20  ;;  %v532_v50 = vsel %vm4593_vm4, %v527_v35, %v531_v44  ;;  %4045 = vmatprep.mubr.msk.bf16.mxu0 %vm703_vm3, %v4880_v30  ;;  %v540_v55 = vor.u32 %v539_v19, %v536_v17  ;;  %v1261_v4 = vrot.slane %v4654_v32, 5  ;;  %v558_v20 = vshrl.u32 %v4883_v61, 16 }
  0x4d   : > { %v4904_v2 = vcombine.low %v522_v58, %v532_v50  ;;  %v550_v18 = vor.u32 %v549_v37, %v545_v41  ;;  %v555_v22 = vrot.slane %v553_v40, 5  ;;  %4441 = vmatprep.subr.msk.bf16.mxu0 %vm752_vm0, %v4888_v45  ;;  %v1259_v17 = vsel %vm4774_vm7, %v3399_v12, %v1258_v59 }
  0x4e   : > { %v541_v44 = vrot.slane %v540_v55, 4  ;;  %v1260_v35 = vrot.slane %v1258_v59, 4  ;;  %v561_v32 = vshll.u32 %v4883_v61, 16  ;;  %v560_v19 = vrot.slane %v558_v20, 4 }
  0x4f   : > { %5615 = vst [vmem:[#allocation16_spill] sm:$0xff] %v4904_v2  ;;  %3891 = vmatprep.mubr.msk.bf16.mxu1 %vm703_vm3, %v4904_v2  ;;  %v551_v58 = vrot.slane %v550_v18, 4  ;;  %v567_v37 = vshll.u32 %v4902_v46, 16  ;;  %v571_v40 = vshrl.u32 %v4902_v46, 16  ;;  %v577_v59 = vshll.u32 %v4907_v3, 16 }
  0x50   : > { %v546_v50 = vsel %vm4593_vm4, %v541_v44, %v545_v41  ;;  %v1262_v55 = vsel %vm4774_vm7, %v1260_v35, %v1261_v4  ;;  %v563_v12 = vrot.slane %v561_v32, 5  ;;  %v3400_v4 = vrot.slane %v4662_v48, 9 }
  0x51   : > { %v556_v2 = vsel %vm4593_vm4, %v551_v58, %v555_v22  ;;  %v4929_v18 = vcombine.low %v1259_v17, %v1262_v55  ;;  %v569_v20 = vrot.slane %v567_v37, 5  ;;  %v573_v0 = vrot.slane %v571_v40, 4  ;;  %v4945_v58 = vld [vmem:[%s4546_s29 + $0xa4] sm:$0x1] }
  0x52   : > { %v4934_v43 = vcombine.low %v546_v50, %v556_v2  ;;  %v564_v41 = vor.u32 %v563_v12, %v560_v19  ;;  %v579_v44 = vrot.slane %v577_v59, 5  ;;  %v1265_v32 = vrot.slane %v4670_v52, 5 }
  0x53   : > { %5616 = vst [vmem:[#allocation17_spill] sm:$0xff] %v4929_v18  ;;  %4046 = vmatmul.mubr.msk.bf16.gmra.mrb[4].mxu0 %vm703_vm3, %v4929_v18  ;;  %v574_v35 = vor.u32 %v573_v0, %v569_v20  ;;  %v1268_v22 = vrot.slane %v4682_v5, 5  ;;  %v582_v17 = vshrl.u32 %v4925_v60, 16  ;;  %v585_v19 = vshll.u32 %v4925_v60, 16 }
  0x54   : > { %5617 = vst [vmem:[#allocation18_spill] sm:$0xff] %v4934_v43  ;;  %3892 = vmatmul.mubr.msk.bf16.gmra.mrb[20].mxu1 %vm703_vm3, %v4934_v43  ;;  %v565_v2 = vrot.slane %v564_v41, 4  ;;  %v591_v37 = vshll.u32 %v4932_v7, 16  ;;  %v595_v0 = vshrl.u32 %v4932_v7, 16  ;;  %v1266_v5 = vsel %vm4774_vm7, %v3400_v4, %v1265_v32 }
  0x55   : > { %v575_v40 = vrot.slane %v574_v35, 4  ;;  %v1267_v50 = vrot.slane %v1265_v32, 4  ;;  %v584_v55 = vrot.slane %v582_v17, 4  ;;  %v587_v59 = vrot.slane %v585_v19, 5  ;;  %v4964_v32 = vld [vmem:[%s4546_s29 + $0xac] sm:$0xf] }
  0x56   : > { %v570_v12 = vsel %vm4593_vm4, %v565_v2, %v569_v20  ;;  %v593_v41 = vrot.slane %v591_v37, 5  ;;  %v597_v43 = vrot.slane %v595_v0, 4  ;;  %v601_v35 = vshll.u32 %v4945_v58, 16 }
  0x57   : > { %v580_v53 = vsel %vm4593_vm4, %v575_v40, %v579_v44  ;;  %v1269_v18 = vsel %vm4774_vm7, %v1267_v50, %v1268_v22  ;;  %v3401_v4 = vrot.slane %v4687_v13, 9  ;;  %v588_v2 = vor.u32 %v587_v59, %v584_v55 }
  0x58   : > { %v4966_v17 = vcombine.low %v570_v12, %v580_v53  ;;  %v4968_v20 = vcombine.low %v1266_v5, %v1269_v18  ;;  %v598_v19 = vor.u32 %v597_v43, %v593_v41  ;;  %v603_v37 = vrot.slane %v601_v35, 5  ;;  %v4978_v18 = vld [vmem:[%s4546_s29 + $0xb0] sm:$0x1] }
  0x59   : > { %v1272_v0 = vrot.slane %v4694_v24, 5  ;;  %v1275_v44 = vrot.slane %v4711_v8, 5  ;;  %v606_v22 = vshrl.u32 %v4955_v25, 16  ;;  %v589_v53 = vrot.slane %v588_v2, 4 }
  0x5a   : > { %5618 = vst [vmem:[#allocation19_spill] sm:$0xff] %v4966_v17  ;;  %5619 = vst [vmem:[#allocation20_spill] sm:$0xff] %v4968_v20  ;;  %3895 = vmatprep.mubr.msk.bf16.mxu1 %vm703_vm3, %v4966_v17  ;;  %4049 = vmatprep.mubr.msk.bf16.mxu0 %vm703_vm3, %v4968_v20  ;;  %v599_v40 = vrot.slane %v598_v19, 4  ;;  %v609_v43 = vshll.u32 %v4955_v25, 16  ;;  %v615_v5 = vshll.u32 %v4964_v32, 16  ;;  %v619_v12 = vshrl.u32 %v4964_v32, 16 }
  0x5b   : > { %v1273_v8 = vsel %vm4774_vm7, %v3401_v4, %v1272_v0  ;;  %v1274_v50 = vrot.slane %v1272_v0, 4  ;;  %v608_v55 = vrot.slane %v606_v22, 4  ;;  %v594_v59 = vsel %vm4593_vm4, %v589_v53, %v593_v41  ;;  %v4990_v17 = vld [vmem:[%s4546_s29 + $0xb4] sm:$0xf]  ;;  %v5002_v53 = vld [vmem:[%s4546_s29 + $0xb8] sm:$0xf] }
  0x5c   : > { %v604_v35 = vsel %vm4593_vm4, %v599_v40, %v603_v37  ;;  %v611_v2 = vrot.slane %v609_v43, 5  ;;  %v617_v19 = vrot.slane %v615_v5, 5  ;;  %v621_v0 = vrot.slane %v619_v12, 4 }
  0x5d   : > { %v4992_v20 = vcombine.low %v594_v59, %v604_v35  ;;  %v1276_v4 = vsel %vm4774_vm7, %v1274_v50, %v1275_v44  ;;  %v625_v22 = vshll.u32 %v4978_v18, 16  ;;  %v3402_v41 = vrot.slane %v4716_v42, 9  ;;  %v5008_v44 = vld [vmem:[%s4546_s29 + $0xbc] sm:$0x1] }
  0x5e   : > { %v4997_v30 = vcombine.low %v1273_v8, %v1276_v4  ;;  %v612_v63 = vor.u32 %v611_v2, %v608_v55  ;;  %v1279_v37 = vrot.slane %v4721_v6, 5  ;;  %v622_v40 = vor.u32 %v621_v0, %v617_v19 }
  0x5f   : > { %5620 = vst [vmem:[#allocation21_spill] sm:$0xff] %v4992_v20  ;;  %3896 = vmatmul.mubr.msk.bf16.gmra.mrb[24].mxu1 %vm703_vm3, %v4992_v20  ;;  %v627_v43 = vrot.slane %v625_v22, 5  ;;  %v1282_v5 = vrot.slane %v4734_v11, 5  ;;  %v630_v50 = vshrl.u32 %v4990_v17, 16  ;;  %v633_v59 = vshll.u32 %v4990_v17, 16 }
  0x60   : > { %5621 = vst [vmem:[#allocation22_spill] sm:$0xff] %v4997_v30  ;;  %4050 = vmatmul.mubr.msk.bf16.gmra.mrb[8].mxu0 %vm703_vm3, %v4997_v30  ;;  %v613_v8 = vrot.slane %v612_v63, 4  ;;  %v1280_v55 = vsel %vm4774_vm7, %v3402_v41, %v1279_v37  ;;  %v1281_v12 = vrot.slane %v1279_v37, 4  ;;  %v623_v35 = vrot.slane %v622_v40, 4 }
  0x61   : > { %v632_v2 = vrot.slane %v630_v50, 4  ;;  %v639_v4 = vshll.u32 %v5002_v53, 16  ;;  %v643_v11 = vshrl.u32 %v5002_v53, 16  ;;  %v635_v20 = vrot.slane %v633_v59, 5 }
  0x62   : > { %v618_v0 = vsel %vm4593_vm4, %v613_v8, %v617_v19  ;;  %v1283_v22 = vsel %vm4774_vm7, %v1281_v12, %v1282_v5  ;;  %v649_v63 = vshll.u32 %v5008_v44, 16  ;;  %v628_v41 = vsel %vm4593_vm4, %v623_v35, %v627_v43 }
  0x63   : > { %v5025_v37 = vcombine.low %v1280_v55, %v1283_v22  ;;  %v641_v40 = vrot.slane %v639_v4, 5  ;;  %v645_v50 = vrot.slane %v643_v11, 4  ;;  %v5027_v30 = vcombine.low %v618_v0, %v628_v41 }
  0x64   : > { %v636_v21 = vor.u32 %v635_v20, %v632_v2  ;;  %v651_v45 = vrot.slane %v649_v63, 5  ;;  %v3403_v42 = vrot.slane %v4738_v15, 9  ;;  %v1286_v5 = vrot.slane %v4743_v27, 5 }
  0x65   : > { %4053 = vmatprep.mubr.msk.bf16.mxu0 %vm703_vm3, %v5025_v37  ;;  %v646_v19 = vor.u32 %v645_v50, %v641_v40  ;;  %v1289_v8 = vrot.slane %v4757_v47, 5  ;;  %v3404_v43 = vrot.slane %v4765_v54, 9  ;;  %3899 = vmatprep.mubr.msk.bf16.mxu1 %vm703_vm3, %v5027_v30  ;;  %v3363_v20 = vcombine.low %v4560_v9, %v4563_v10 }
  0x66   : > { %v637_v55 = vrot.slane %v636_v21, 4  ;;  %v1293_v12 = vrot.slane %v4781_v36, 5  ;;  %v1296_v59 = vrot.slane %v4794_v51, 5  ;;  %v1287_v2 = vsel %vm4774_vm7, %v3403_v42, %v1286_v5 }
  0x67   : > { %v647_v35 = vrot.slane %v646_v19, 4  ;;  %v1288_v4 = vrot.slane %v1286_v5, 4  ;;  %v1300_v47 = vrot.slane %v4822_v31, 5  ;;  %v3405_v9 = vrot.slane %v4806_v56, 9 }
  0x68   : > { %v642_v11 = vsel %vm4593_vm4, %v637_v55, %v641_v40  ;;  %v1294_v21 = vsel %vm4774_vm7, %v3404_v43, %v1293_v12  ;;  %v1295_v0 = vrot.slane %v1293_v12, 4  ;;  %v1303_v42 = vrot.slane %v4827_v49, 5 }
  0x69   : > { %v652_v10 = vsel %vm4593_vm4, %v647_v35, %v651_v45  ;;  %v1290_v51 = vsel %vm4774_vm7, %v1288_v4, %v1289_v8  ;;  %v1302_v22 = vrot.slane %v1300_v47, 4  ;;  %v3406_v19 = vrot.slane %v4853_v29, 9 }
  0x6a   : > { %v5054_v63 = vcombine.low %v642_v11, %v652_v10  ;;  %v5056_v41 = vcombine.low %v1287_v2, %v1290_v51  ;;  %v1297_v40 = vsel %vm4774_vm7, %v1295_v0, %v1296_v59  ;;  %v1307_v5 = vrot.slane %v4859_v16, 5 }
  0x6b   : > { %v5060_v50 = vcombine.low %v1294_v21, %v1297_v40  ;;  %v1310_v49 = vrot.slane %v4869_v1, 5  ;;  %v1301_v45 = vsel %vm4774_vm7, %v3405_v9, %v1300_v47  ;;  %v1304_v8 = vsel %vm4774_vm7, %v1302_v22, %v1303_v42 }
  0x6c   : > { %3900 = vmatmul.mubr.msk.bf16.gmra.mrb[28].mxu1 %vm703_vm3, %v5054_v63  ;;  %4054 = vmatmul.mubr.msk.bf16.gmra.mrb[12].mxu0 %vm703_vm3, %v5056_v41  ;;  %v1309_v43 = vrot.slane %v1307_v5, 4  ;;  %v1314_v55 = vrot.slane %v4902_v46, 5  ;;  %v1321_v12 = vrot.slane %v4932_v7, 5  ;;  %v1308_v59 = vsel %vm4774_vm7, %v3406_v19, %v1307_v5 }
  0x6d   : > { %3905 = vmatprep.mubr.msk.bf16.mxu1 %vm703_vm3, %v3363_v20  ;;  %4057 = vmatprep.mubr.msk.bf16.mxu0 %vm703_vm3, %v5060_v50  ;;  %v5082_v20 = vcombine.low %v1301_v45, %v1304_v8  ;;  %v3407_v35 = vrot.slane %v4883_v61, 9  ;;  %v1317_v4 = vrot.slane %v4907_v3, 5  ;;  %v5088_v47 = vcombine.low %v4589_v33, %v4602_v39  ;;  %v5100_v3 = vld [vmem:[%s5562_s1 + $0xc] sm:$0xf] }
  0x6e   : > { %v1311_v1 = vsel %vm4774_vm7, %v1309_v43, %v1310_v49  ;;  %v1316_v2 = vrot.slane %v1314_v55, 4  ;;  %v3408_v11 = vrot.slane %v4925_v60, 9  ;;  %v1439_v21 = vsel %vm752_vm0, %v4642_v23, 0 }
  0x6f   : > { %v5093_v0 = vcombine.low %v1308_v59, %v1311_v1  ;;  %v1323_v9 = vrot.slane %v1321_v12, 4  ;;  %v1324_v10 = vrot.slane %v4945_v58, 5  ;;  %v1328_v51 = vrot.slane %v4964_v32, 5 }
  0x70   : > { %v1315_v33 = vsel %vm4774_vm7, %v3407_v35, %v1314_v55  ;;  %v1318_v39 = vsel %vm4774_vm7, %v1316_v2, %v1317_v4  ;;  %v5114_v23 = vcombine.low %v4616_v57, %v4621_v62  ;;  %v1322_v58 = vsel %vm4774_vm7, %v3408_v11, %v1321_v12 }
  0x71   : > { %v5120_v22 = vcombine.low %v4738_v15, %v4743_v27  ;;  %v1325_v42 = vsel %vm4774_vm7, %v1323_v9, %v1324_v10  ;;  %v3409_v40 = vrot.slane %v4955_v25, 9  ;;  %v1335_v19 = vrot.slane %v5002_v53, 5 }
  0x72   : > { %v5130_v57 = vcombine.low %v4765_v54, %v4781_v36  ;;  %v5134_v62 = vcombine.low %v1315_v33, %v1318_v39  ;;  %v1330_v15 = vrot.slane %v1328_v51, 4  ;;  %v1331_v27 = vrot.slane %v4978_v18, 5  ;;  %v261_v18 = vld [vmem:[%s4546_s29 + $0xc8] sm:$0x1] }
  0x73   : > { %v5139_v5 = vcombine.low %v4806_v56, %v4822_v31  ;;  %v5143_v49 = vcombine.low %v4853_v29, %v4859_v16  ;;  %v5147_v54 = vcombine.low %v4883_v61, %v4902_v46  ;;  %v5151_v36 = vcombine.low %v4925_v60, %v4932_v7  ;;  %v5170_v61 = vld [vmem:[%s4546_s29 + $0xc4] sm:$0xf] }
  0x74   : > { %3906 = vmatmul.mubr.msk.bf16.vlgmr.msra.gmra.mrb[0].mxu1 %vm703_vm3, %v4599_v38  ;;  %4058 = vmatmul.mubr.msk.bf16.gmra.mrb[16].mxu0 %vm703_vm3, %v5082_v20  ;;  %v5155_v45 = vcombine.low %v4955_v25, %v4964_v32  ;;  %v5159_v56 = vcombine.low %v4635_v14, %v4647_v28  ;;  %v5161_v31 = vcombine.low %v1322_v58, %v1325_v42  ;;  %v3410_v16 = vrot.slane %v4990_v17, 9  ;;  %v5622_v42 = vld [vmem:[#allocation5_spill] sm:$0xff] }
  0x75   : > { %3938 = vmatpush3.bf16.msra.mxu1 %v1439_v21  ;;  %3909 = vmatprep.mubr.msk.bf16.mxu1 %vm703_vm3, %v5088_v47  ;;  %v5165_v29 = vcombine.low %v4990_v17, %v5002_v53  ;;  %v1337_v7 = vrot.slane %v1335_v19, 4  ;;  %v1338_v60 = vrot.slane %v5008_v44, 5  ;;  %v1329_v14 = vsel %vm4774_vm7, %v3409_v40, %v1328_v51  ;;  %v5190_v17 = vld [vmem:[%s4546_s29 + $0xc0] sm:$0xf] }
  0x76   : > { %4061 = vmatprep.mubr.msk.bf16.mxu0 %vm703_vm3, %v5093_v0  ;;  %4436 = vmatprep.subr.msk.bf16.mxu1 %vm752_vm0, %v5100_v3  ;;  %v1332_v28 = vsel %vm4774_vm7, %v1330_v15, %v1331_v27  ;;  %v2071_v25 = vrot.slane %v5170_v61, 5  ;;  %v1336_v46 = vsel %vm4774_vm7, %v3410_v16, %v1335_v19  ;;  %v5195_v53 = vcombine.low %v4662_v48, %v4670_v52 }
  0x77   : > { %v1339_v32 = vsel %vm4774_vm7, %v1337_v7, %v1338_v60  ;;  %v5197_v44 = vcombine.low %v1329_v14, %v1332_v28  ;;  %v5201_v8 = vcombine.low %v4687_v13, %v4694_v24  ;;  %v1841_v43 = vshrl.u32 %v5190_v17, 16  ;;  %v3536_v60 = vld [vmem:[%s5562_s1 + $0x20] sm:$0xf]  ;;  %v4470_v14 = vld [vmem:[%s4546_s29 + $0x4] sm:$0xf] }
  0x78   : > { %v1844_v55 = vshll.u32 %v5190_v17, 16  ;;  %v1850_v12 = vshll.u32 %v5170_v61, 16  ;;  %v1854_v59 = vshrl.u32 %v5170_v61, 16  ;;  %v5207_v1 = vcombine.low %v1336_v46, %v1339_v32  ;;  %v4472_v32 = vld [vmem:[%s4546_s29] sm:$0xf] }
  0x79   : > { %v3480_v35 = vrot.slane %v5190_v17, 9  ;;  %v2073_v48 = vrot.slane %v2071_v25, 4  ;;  %v2074_v52 = vrot.slane %v261_v18, 5  ;;  %v1843_v2 = vrot.slane %v1841_v43, 4 }
  0x7a   : > { %v1846_v4 = vrot.slane %v1844_v55, 5  ;;  %v1852_v11 = vrot.slane %v1850_v12, 5  ;;  %v1856_v21 = vrot.slane %v1854_v59, 4  ;;  %v1860_v9 = vshll.u32 %v261_v18, 16 }
  0x7b   : > { %v2072_v10 = vsel %vm4774_vm7, %v3480_v35, %v2071_v25  ;;  %v2075_v51 = vsel %vm4774_vm7, %v2073_v48, %v2074_v52  ;;  %v5224_v40 = vcombine.low %v5622_v42, %v4721_v6  ;;  %v5623_v6 = vld [vmem:[#allocation15_spill] sm:$0xff]  ;;  %v1230_v28 = vrot.slane %v4470_v14, 5  ;;  %v5624_v48 = vld [vmem:[#allocation10_spill] sm:$0xff]  ;;  %v5625_v52 = vld [vmem:[#allocation12_spill] sm:$0xff] }
  0x7c   : > { %3910 = vmatmul.mubr.msk.bf16.gmra.mrb[4].mxu1 %vm703_vm3, %v5114_v23  ;;  %4062 = vmatmul.mubr.msk.bf16.gmra.mrb[20].mxu0 %vm703_vm3, %v5134_v62  ;;  %v1847_v13 = vor.u32 %v1846_v4, %v1843_v2  ;;  %v1857_v24 = vor.u32 %v1856_v21, %v1852_v11  ;;  %v1862_v58 = vrot.slane %v1860_v9, 5  ;;  %v5226_v19 = vcombine.low %v2072_v10, %v2075_v51  ;;  %v4471_v25 = vld [vmem:[%s4546_s29 + $0x8] sm:$0x1]  ;;  %v4473_v2 = vld [vmem:[%s5562_s1 + $0x10] sm:$0xf]  ;;  %v5627_v4 = vld [vmem:[#allocation17_spill] sm:$0xff] }
  0x7d   : > { %3913 = vmatprep.mubr.msk.bf16.mxu1 %vm703_vm3, %v5159_v56  ;;  %4065 = vmatprep.mubr.msk.bf16.mxu0 %vm703_vm3, %v5161_v31  ;;  %v2519_v7 = vsel %vm752_vm0, %v5623_v6, 0  ;;  %v1233_v46 = vrot.slane %v4471_v25, 5  ;;  %v3395_v18 = vrot.slane %v4472_v32, 9  ;;  %v1232_v43 = vrot.slane %v1230_v28, 4  ;;  %v5628_v21 = vld [vmem:[#allocation20_spill] sm:$0xff]  ;;  %v5635_v42 = vld [vmem:[#allocation9_spill] sm:$0xff] }
  0x7e   : > { %v1848_v33 = vrot.slane %v1847_v13, 4  ;;  %v1858_v39 = vrot.slane %v1857_v24, 4  ;;  %v1645_v35 = vsel %vm752_vm0, %v5100_v3, 0  ;;  %v5626_v3 = vld [vmem:[#allocation14_spill] sm:$0xff]  ;;  %v5321_v24 = vld [vmem:[%s4546_s29 + $0xcc] sm:$0xf] }
  0x7f   : > { %v1231_v55 = vsel %vm4774_vm7, %v3395_v18, %v1230_v28  ;;  %v1234_v12 = vsel %vm4774_vm7, %v1232_v43, %v1233_v46  ;;  %v5629_v13 = vld [vmem:[#allocation22_spill] sm:$0xff]  ;;  %v5324_v9 = vld [vmem:[%s4546_s29 + $0xd0] sm:$0xf]  ;;  %v2731_v10 = vsel %vm752_vm0, %v3536_v60, 0  ;;  %v2490_v14 = vshll.u32 %v5321_v24, 16  ;;  %v5641_v46 = vld [vmem:[#allocation19_spill] sm:$0xff] }
  0x80   : > { %v1853_v15 = vsel %vm4593_vm4, %v1848_v33, %v1852_v11  ;;  %v1863_v27 = vsel %vm4593_vm4, %v1858_v39, %v1862_v58  ;;  %v3412_v59 = vcombine.low %v1231_v55, %v1234_v12  ;;  %v5310_v11 = vcombine.low %v5190_v17, %v5170_v61  ;;  %v5630_v17 = vld [vmem:[#allocation3_spill] sm:$0xff]  ;;  %v5631_v51 = vld [vmem:[#allocation4_spill] sm:$0xff]  ;;  %v5632_v33 = vld [vmem:[#allocation6_spill] sm:$0xff] }
  0x81   : > { %v5232_v16 = vcombine.low %v1853_v15, %v1863_v27  ;;  %v3500_v61 = vcombine.low %v5321_v24, %v5324_v9  ;;  %v5633_v39 = vld [vmem:[#allocation7_spill] sm:$0xff]  ;;  %v5634_v58 = vld [vmem:[#allocation8_spill] sm:$0xff]  ;;  %v5637_v27 = vld [vmem:[#allocation13_spill] sm:$0xff]  ;;  %v2500_v28 = vshrl.u32 %v5324_v9, 16  ;;  %v2492_v32 = vrot.slane %v2490_v14, 5 }
  0x82   : > { %v5636_v15 = vld [vmem:[#allocation11_spill] sm:$0xff]  ;;  %v5638_v6 = vld [vmem:[#allocation16_spill] sm:$0xff]  ;;  %v5640_v25 = vld [vmem:[#allocation2_spill] sm:$0xff]  ;;  %v2717_v34 = vrot.slane %v5324_v9, 5 }
  0x83   : > { %v2502_v43 = vrot.slane %v2500_v28, 4  ;;  %v264_v55 = vld [vmem:[%s4546_s29 + $0xd4] sm:$0x1]  ;;  %v5642_v12 = vld [vmem:[#allocation21_spill] sm:$0xff] }
  0x84   : > { %3914 = vmatmul.mubr.msk.bf16.gmra.mrb[8].mxu1 %vm703_vm3, %v5195_v53  ;;  %4066 = vmatmul.mubr.msk.bf16.gmra.mrb[24].mxu0 %vm703_vm3, %v5197_v44 }
  0x85   : > { %3917 = vmatprep.mubr.msk.bf16.mxu1 %vm703_vm3, %v5201_v8  ;;  %4069 = vmatprep.mubr.msk.bf16.mxu0 %vm703_vm3, %v5207_v1 }
  0x8c   : > { %3918 = vmatmul.mubr.msk.bf16.gmra.mrb[12].mxu1 %vm703_vm3, %v5224_v40  ;;  %4070 = vmatmul.mubr.msk.bf16.gmra.mrb[28].mxu0 %vm703_vm3, %v5226_v19 }
  0x8d   : > { %3921 = vmatprep.mubr.msk.bf16.mxu1 %vm703_vm3, %v5120_v22  ;;  %4075 = vmatprep.mubr.msk.bf16.mxu0 %vm703_vm3, %v5088_v47 }
  0x94   : > { %3922 = vmatmul.mubr.msk.bf16.gmra.mrb[16].mxu1 %vm703_vm3, %v5130_v57  ;;  %4076 = vmatmul.mubr.msk.bf16.vlgmr.msra.gmra.mrb[0].mxu0 %vm703_vm3, %v5114_v23 }
  0x95   : > { %4108 = vmatpush3.bf16.msra.mxu0 %v2519_v7  ;;  %3925 = vmatprep.mubr.msk.bf16.mxu1 %vm703_vm3, %v5139_v5  ;;  %v5639_v7 = vld [vmem:[#allocation18_spill] sm:$0xff] }
  0x96   : > { %4079 = vmatprep.mubr.msk.bf16.mxu0 %vm703_vm3, %v5159_v56  ;;  %4442 = vmatprep.subr.msk.bf16.mxu0 %vm752_vm0, %v3536_v60  ;;  %v2487_v60 = vshrl.u32 %v5321_v24, 16 }
  0x9c   : > { %3926 = vmatmul.mubr.msk.bf16.gmra.mrb[20].mxu1 %vm703_vm3, %v5143_v49  ;;  %4080 = vmatmul.mubr.msk.bf16.gmra.mrb[4].mxu0 %vm703_vm3, %v5195_v53 }
  0x9d   : > { %3929 = vmatprep.mubr.msk.bf16.mxu1 %vm703_vm3, %v5147_v54  ;;  %4083 = vmatprep.mubr.msk.bf16.mxu0 %vm703_vm3, %v5201_v8 }
  0xa4   : > { %3930 = vmatmul.mubr.msk.bf16.gmra.mrb[24].mxu1 %vm703_vm3, %v5151_v36  ;;  %4084 = vmatmul.mubr.msk.bf16.gmra.mrb[8].mxu0 %vm703_vm3, %v5224_v40 }
  0xa5   : > { %3933 = vmatprep.mubr.msk.bf16.mxu1 %vm703_vm3, %v5155_v45  ;;  %4087 = vmatprep.mubr.msk.bf16.mxu0 %vm703_vm3, %v5120_v22 }
  0xac   : > { %3934 = vmatmul.mubr.msk.bf16.gmra.mrb[28].mxu1 %vm703_vm3, %v5165_v29  ;;  %4088 = vmatmul.mubr.msk.bf16.gmra.mrb[12].mxu0 %vm703_vm3, %v5130_v57 }
  0xad   : > { %3939 = vmatprep.mubr.msk.bf16.mxu1 %vm703_vm3, %v3412_v59  ;;  %4091 = vmatprep.mubr.msk.bf16.mxu0 %vm703_vm3, %v5139_v5 }
  0xb4   : > { %3940 = vmatmul.mubr.msk.bf16.vlgmr.msra.gmra.mrb[0].mxu1 %vm703_vm3, %v5624_v48  ;;  %4092 = vmatmul.mubr.msk.bf16.gmra.mrb[16].mxu0 %vm703_vm3, %v5143_v49 }
  0xb5   : > { %3972 = vmatpush3.bf16.msra.mxu1 %v1645_v35  ;;  %3943 = vmatprep.mubr.msk.bf16.mxu1 %vm703_vm3, %v5625_v52  ;;  %v2506_v35 = vshll.u32 %v264_v55, 16 }
  0xb6   : > { %4095 = vmatprep.mubr.msk.bf16.mxu0 %vm703_vm3, %v5147_v54  ;;  %4438 = vmatprep.subr.msk.bf16.mxu1 %vm752_vm0, %v4473_v2 }
  0xbc   : > { %3944 = vmatmul.mubr.msk.bf16.gmra.mrb[4].mxu1 %vm703_vm3, %v5626_v3  ;;  %4096 = vmatmul.mubr.msk.bf16.gmra.mrb[20].mxu0 %vm703_vm3, %v5151_v36 }
  0xbd   : > { %3947 = vmatprep.mubr.msk.bf16.mxu1 %vm703_vm3, %v5627_v4  ;;  %4099 = vmatprep.mubr.msk.bf16.mxu0 %vm703_vm3, %v5155_v45 }
  0xc4   : > { %3948 = vmatmul.mubr.msk.bf16.gmra.mrb[8].mxu1 %vm703_vm3, %v5628_v21  ;;  %4100 = vmatmul.mubr.msk.bf16.gmra.mrb[24].mxu0 %vm703_vm3, %v5165_v29 }
  0xc5   : > { %3951 = vmatprep.mubr.msk.bf16.mxu1 %vm703_vm3, %v5629_v13  ;;  %4103 = vmatprep.mubr.msk.bf16.mxu0 %vm703_vm3, %v5310_v11 }
  0xcc   : > { %3952 = vmatmul.mubr.msk.bf16.gmra.mrb[12].mxu1 %vm703_vm3, %v5025_v37  ;;  %4104 = vmatmul.mubr.msk.bf16.gmra.mrb[28].mxu0 %vm703_vm3, %v3500_v61  ;;  %v2508_v61 = vrot.slane %v2506_v35, 5 }
  0xcd   : > { %3955 = vmatprep.mubr.msk.bf16.mxu1 %vm703_vm3, %v5056_v41  ;;  %4109 = vmatprep.mubr.msk.bf16.mxu0 %vm703_vm3, %v5630_v17 }
  0xd4   : > { %3956 = vmatmul.mubr.msk.bf16.gmra.mrb[16].mxu1 %vm703_vm3, %v5060_v50  ;;  %4110 = vmatmul.mubr.msk.bf16.vlgmr.msra.gmra.mrb[0].mxu0 %vm703_vm3, %v5631_v51 }
  0xd5   : > { %4142 = vmatpush3.bf16.msra.mxu0 %v2731_v10  ;;  %3959 = vmatprep.mubr.msk.bf16.mxu1 %vm703_vm3, %v5082_v20 }
  0xd6   : > { %4113 = vmatprep.mubr.msk.bf16.mxu0 %vm703_vm3, %v5632_v33 }
  0xdc   : > { %3960 = vmatmul.mubr.msk.bf16.gmra.mrb[20].mxu1 %vm703_vm3, %v5093_v0  ;;  %4114 = vmatmul.mubr.msk.bf16.gmra.mrb[4].mxu0 %vm703_vm3, %v5633_v39 }
  0xdd   : > { %3963 = vmatprep.mubr.msk.bf16.mxu1 %vm703_vm3, %v5134_v62  ;;  %4117 = vmatprep.mubr.msk.bf16.mxu0 %vm703_vm3, %v5634_v58 }
  0xe4   : > { %3964 = vmatmul.mubr.msk.bf16.gmra.mrb[24].mxu1 %vm703_vm3, %v5161_v31  ;;  %4118 = vmatmul.mubr.msk.bf16.gmra.mrb[8].mxu0 %vm703_vm3, %v5635_v42 }
  0xe5   : > { %3967 = vmatprep.mubr.msk.bf16.mxu1 %vm703_vm3, %v5197_v44  ;;  %4121 = vmatprep.mubr.msk.bf16.mxu0 %vm703_vm3, %v5636_v15 }
  0xec   : > { %3968 = vmatmul.mubr.msk.bf16.gmra.mrb[28].mxu1 %vm703_vm3, %v5207_v1  ;;  %4122 = vmatmul.mubr.msk.bf16.gmra.mrb[12].mxu0 %vm703_vm3, %v5637_v27 }
  0xed   : > { %3973 = vmatprep.mubr.msk.bf16.mxu1 %vm703_vm3, %v4599_v38  ;;  %4125 = vmatprep.mubr.msk.bf16.mxu0 %vm703_vm3, %v5638_v6  ;;  %v2496_v38 = vshll.u32 %v5324_v9, 16 }
  0xef   : > { %v2498_v18 = vrot.slane %v2496_v38, 5 }
  0xf1   : > { %v2503_v59 = vor.u32 %v2502_v43, %v2498_v18 }
  0xf3   : > { %v2504_v2 = vrot.slane %v2503_v59, 4 }
  0xf4   : > { %3974 = vmatmul.mubr.msk.bf16.vlgmr.msra.gmra.mrb[0].mxu1 %vm703_vm3, %v5088_v47  ;;  %4126 = vmatmul.mubr.msk.bf16.gmra.mrb[16].mxu0 %vm703_vm3, %v5639_v7  ;;  %v2489_v47 = vrot.slane %v2487_v60, 4 }
  0xf5   : > { %4176 = vmatpush3.bf16.msra.mxu1 %v5640_v25  ;;  %3977 = vmatprep.mubr.msk.bf16.mxu1 %vm703_vm3, %v5114_v23 }
  0xf6   : > { %4129 = vmatprep.mubr.msk.bf16.mxu0 %vm703_vm3, %v5641_v46  ;;  %v2493_v23 = vor.u32 %v2492_v32, %v2489_v47 }
  0xf8   : > { %v2494_v48 = vrot.slane %v2493_v23, 4 }
  0xfc   : > { %3978 = vmatmul.mubr.msk.bf16.gmra.mrb[4].mxu1 %vm703_vm3, %v5159_v56  ;;  %4130 = vmatmul.mubr.msk.bf16.gmra.mrb[20].mxu0 %vm703_vm3, %v5642_v12  ;;  %v2499_v56 = vsel %vm4593_vm4, %v2494_v48, %v2498_v18 }
  0xfd   : > { %3981 = vmatprep.mubr.msk.bf16.mxu1 %vm703_vm3, %v5195_v53  ;;  %4133 = vmatprep.mubr.msk.bf16.mxu0 %vm703_vm3, %v5027_v30  ;;  %v2509_v53 = vsel %vm4593_vm4, %v2504_v2, %v2508_v61 }
  0xfe   : > { %v3518_v17 = vcombine.low %v2499_v56, %v2509_v53 }
 0x104   : > { %3982 = vmatmul.mubr.msk.bf16.gmra.mrb[8].mxu1 %vm703_vm3, %v5201_v8  ;;  %4134 = vmatmul.mubr.msk.bf16.gmra.mrb[24].mxu0 %vm703_vm3, %v5054_v63 }
 0x105   : > { %3985 = vmatprep.mubr.msk.bf16.mxu1 %vm703_vm3, %v5224_v40  ;;  %4137 = vmatprep.mubr.msk.bf16.mxu0 %vm703_vm3, %v5232_v16 }
 0x10c   : > { %3986 = vmatmul.mubr.msk.bf16.gmra.mrb[12].mxu1 %vm703_vm3, %v5120_v22  ;;  %4138 = vmatmul.mubr.msk.bf16.gmra.mrb[28].mxu0 %vm703_vm3, %v3518_v17 }
 0x10d   : > { %3989 = vmatprep.mubr.msk.bf16.mxu1 %vm703_vm3, %v5130_v57  ;;  %4143 = vmatprep.mubr.msk.bf16.mxu0 %vm703_vm3, %v5625_v52  ;;  %v5492_v52 = vld [vmem:[%s5563_s2] ss:$0 sm:$0xff] }
 0x114   : > { %3990 = vmatmul.mubr.msk.bf16.gmra.mrb[16].mxu1 %vm703_vm3, %v5139_v5  ;;  %4144 = vmatmul.mubr.msk.bf16.vlgmr.msra.gmra.mrb[0].mxu0 %vm703_vm3, %v5626_v3 }
 0x115   : > { %3993 = vmatprep.mubr.msk.bf16.mxu1 %vm703_vm3, %v5143_v49  ;;  %4147 = vmatprep.mubr.msk.bf16.mxu0 %vm703_vm3, %v5627_v4 }
 0x11c   : > { %3994 = vmatmul.mubr.msk.bf16.gmra.mrb[20].mxu1 %vm703_vm3, %v5147_v54  ;;  %4148 = vmatmul.mubr.msk.bf16.gmra.mrb[4].mxu0 %vm703_vm3, %v5628_v21 }
 0x11d   : > { %3997 = vmatprep.mubr.msk.bf16.mxu1 %vm703_vm3, %v5151_v36  ;;  %4151 = vmatprep.mubr.msk.bf16.mxu0 %vm703_vm3, %v5629_v13 }
 0x124   : > { %3998 = vmatmul.mubr.msk.bf16.gmra.mrb[24].mxu1 %vm703_vm3, %v5155_v45  ;;  %4152 = vmatmul.mubr.msk.bf16.gmra.mrb[8].mxu0 %vm703_vm3, %v5025_v37  ;;  %v3535_v37 = vrot.slane %v5321_v24, 9 }
 0x125   : > { %4001 = vmatprep.mubr.msk.bf16.mxu1 %vm703_vm3, %v5165_v29  ;;  %4155 = vmatprep.mubr.msk.bf16.mxu0 %vm703_vm3, %v5056_v41  ;;  %v2719_v41 = vrot.slane %v2717_v34, 4 }
 0x12c   : > { %4002 = vmatmul.mubr.msk.bf16.gmra.mrb[28].mxu1 %vm703_vm3, %v5310_v11  ;;  %4156 = vmatmul.mubr.msk.bf16.gmra.mrb[12].mxu0 %vm703_vm3, %v5060_v50  ;;  %v2720_v50 = vrot.slane %v264_v55, 5 }
 0x12d   : > { %4023 = vmatprep.mubr.msk.bf16.mxu1 %vm703_vm3, %v5637_v27  ;;  %4159 = vmatprep.mubr.msk.bf16.mxu0 %vm703_vm3, %v5082_v20  ;;  %v2718_v20 = vsel %vm4774_vm7, %v3535_v37, %v2717_v34 }
 0x134   : > { %4024 = vmatmul.mubr.msk.bf16.vlgmr.msra.gmra.mrb[16].mxu1 %vm703_vm3, %v5638_v6  ;;  %4160 = vmatmul.mubr.msk.bf16.gmra.mrb[16].mxu0 %vm703_vm3, %v5093_v0  ;;  %v2721_v0 = vsel %vm4774_vm7, %v2719_v41, %v2720_v50 }
 0x135   : > { %4027 = vmatprep.mubr.msk.bf16.mxu1 %vm703_vm3, %v5639_v7  ;;  %4163 = vmatprep.mubr.msk.bf16.mxu0 %vm703_vm3, %v5134_v62  ;;  %v3537_v22 = vcombine.low %v2718_v20, %v2721_v0 }
 0x13c   : > { %4028 = vmatmul.mubr.msk.bf16.gmra.mrb[20].mxu1 %vm703_vm3, %v5641_v46  ;;  %4164 = vmatmul.mubr.msk.bf16.gmra.mrb[20].mxu0 %vm703_vm3, %v5161_v31 }
 0x13d   : > { %4031 = vmatprep.mubr.msk.bf16.mxu1 %vm703_vm3, %v5642_v12  ;;  %4167 = vmatprep.mubr.msk.bf16.mxu0 %vm703_vm3, %v5197_v44 }
 0x144   : > { %4032 = vmatmul.mubr.msk.bf16.gmra.mrb[24].mxu1 %vm703_vm3, %v5027_v30  ;;  %4168 = vmatmul.mubr.msk.bf16.gmra.mrb[24].mxu0 %vm703_vm3, %v5207_v1 }
 0x145   : > { %4035 = vmatprep.mubr.msk.bf16.mxu1 %vm703_vm3, %v5054_v63  ;;  %4171 = vmatprep.mubr.msk.bf16.mxu0 %vm703_vm3, %v5226_v19 }
 0x14c   : > { %4036 = vmatmul.mubr.msk.bf16.gmra.mrb[28].mxu1 %vm703_vm3, %v5232_v16  ;;  %4172 = vmatmul.mubr.msk.bf16.gmra.mrb[28].mxu0 %vm703_vm3, %v3537_v22 }
 0x1c7   : > { %v3975_v30 = vpop.f32.mrb[0].mxu1 }
 0x1c8   : > { %v1681_v57 = vpop.f32.mrb[1].mxu1 }
 0x1c9   : > { %v3976_v62 = vpop.f32.mrb[2].mxu1 }
 0x1ca   : > { %v1684_v63 = vpop.f32.mrb[3].mxu1 }
 0x1cf   : > { %v3979_v5 = vpop.f32.mrb[4].mxu1 }
 0x1d0   : > { %v1697_v49 = vpop.f32.mrb[5].mxu1 }
 0x1d1   : > { %v3980_v54 = vpop.f32.mrb[6].mxu1 }
 0x1d2   : > { %v1700_v36 = vpop.f32.mrb[7].mxu1 }
 0x1d7   : > { %v3983_v45 = vpop.f32.mrb[8].mxu1 }
 0x1d8   : > { %v5474_v31 = vpop.f32.mrb[9].mxu1 }
 0x1d9   : > { %v5476_v26 = vpop.f32.mrb[10].mxu1 }
 0x1da   : > { %v5478_v29 = vpop.f32.mrb[11].mxu1 }
 0x1df   : > { %v5480_v44 = vpop.f32.mrb[12].mxu1 }
 0x1e0   : > { %v5483_v8 = vpop.f32.mrb[13].mxu1 }
 0x1e1   : > { %v5485_v1 = vpop.f32.mrb[14].mxu1 }
 0x1e2   : > { %v5487_v40 = vpop.f32.mrb[15].mxu1 }
 0x1e7   : > { %v4145_v19 = vpop.f32.mrb[0].mxu0 }
 0x1e8   : > { %v4177_v16 = vadd.f32 %v4145_v19, %v3975_v30  ;;  %v2767_v3 = vpop.f32.mrb[1].mxu0 }
 0x1e9   : > { %v4178_v4 = vadd.f32 %v2767_v3, %v1681_v57  ;;  %v4146_v11 = vpop.f32.mrb[2].mxu0 }
 0x1ea   : > { %v4179_v21 = vadd.f32 %v4146_v11, %v3976_v62  ;;  %v2770_v13 = vpop.f32.mrb[3].mxu0  ;;  %v2935_v10 = vadd.f32 %v4177_v16, %v5492_v52 }
 0x1eb   : > { %v2933_v24 = vadd.f32 %v4178_v4, %v5492_v52  ;;  %v4180_v9 = vadd.f32 %v2770_v13, %v1684_v63 }
 0x1ec   : > { %v2936_v51 = vadd.f32 %v4179_v21, %v5492_v52  ;;  %v3164_v14 = vmul.f32 %v2935_v10, %v2935_v10 }
 0x1ed   : > { %v2934_v33 = vadd.f32 %v4180_v9, %v5492_v52  ;;  %v3162_v58 = vmul.f32 %v2933_v24, %v2933_v24 }
 0x1ee   : > { %v3629_v39 = vpack.c.bf16 %v2936_v51, %v2935_v10  ;;  %v3165_v47 = vmul.f32 %v2936_v51, %v2936_v51 }
 0x1ef   : > { %v3624_v42 = vpack.c.bf16 %v2934_v33, %v2933_v24  ;;  %v3125_v15 = vadd.f32 %v2934_v33, %v2933_v24  ;;  %v3163_v27 = vmul.f32 %v2934_v33, %v2934_v33  ;;  %v4149_v6 = vpop.f32.mrb[4].mxu0 }
 0x1f0   : > { %3701 = vst [vmem:[%s5500_s24 + $0x8] sm:$0xff] %v3629_v39   ;;  %v4181_v7 = vadd.f32 %v4149_v6, %v3979_v5  ;;  %v2783_v60 = vpop.f32.mrb[5].mxu0 }
 0x1f1   : > { %3625 = vst [vmem:[%s5500_s24] sm:$0xff] %v3624_v42   ;;  %v3126_v28 = vadd.f32 %v3125_v15, %v2935_v10  ;;  %v3194_v25 = vadd.f32 %v3163_v27, %v3162_v58  ;;  %v4182_v38 = vadd.f32 %v2783_v60, %v1697_v49  ;;  %v4150_v46 = vpop.f32.mrb[6].mxu0 }
 0x1f2   : > { %v4183_v32 = vadd.f32 %v4150_v46, %v3980_v54  ;;  %v2786_v18 = vpop.f32.mrb[7].mxu0  ;;  %v2939_v59 = vadd.f32 %v4181_v7, %v5492_v52 }
 0x1f3   : > { %v3195_v43 = vadd.f32 %v3194_v25, %v3164_v14  ;;  %v2937_v55 = vadd.f32 %v4182_v38, %v5492_v52  ;;  %v3127_v12 = vadd.f32 %v3126_v28, %v2936_v51  ;;  %v4184_v23 = vadd.f32 %v2786_v18, %v1700_v36 }
 0x1f4   : > { %v2940_v35 = vadd.f32 %v4183_v32, %v5492_v52  ;;  %v3168_v22 = vmul.f32 %v2939_v59, %v2939_v59 }
 0x1f5   : > { %v3128_v48 = vadd.f32 %v3127_v12, %v2937_v55  ;;  %v3166_v2 = vmul.f32 %v2937_v55, %v2937_v55  ;;  %v3196_v61 = vadd.f32 %v3195_v43, %v3165_v47  ;;  %v2938_v56 = vadd.f32 %v4184_v23, %v5492_v52 }
 0x1f6   : > { %v3639_v53 = vpack.c.bf16 %v2940_v35, %v2939_v59  ;;  %v3169_v5 = vmul.f32 %v2940_v35, %v2940_v35 }
 0x1f7   : > { %v3197_v17 = vadd.f32 %v3196_v61, %v3166_v2  ;;  %v3634_v34 = vpack.c.bf16 %v2938_v56, %v2937_v55  ;;  %v3129_v37 = vadd.f32 %v3128_v48, %v2938_v56  ;;  %v3167_v41 = vmul.f32 %v2938_v56, %v2938_v56  ;;  %v4153_v50 = vpop.f32.mrb[8].mxu0 }
 0x1f8   : > { %3703 = vst [vmem:[%s5500_s24 + $0x18] sm:$0xff] %v3639_v53   ;;  %v4185_v20 = vadd.f32 %v4153_v50, %v3983_v45  ;;  %v2799_v0 = vpop.f32.mrb[9].mxu0 }
 0x1f9   : > { %3702 = vst [vmem:[%s5500_s24 + $0x10] sm:$0xff] %v3634_v34   ;;  %v3130_v30 = vadd.f32 %v3129_v37, %v2939_v59  ;;  %v3198_v57 = vadd.f32 %v3197_v17, %v3167_v41  ;;  %v4186_v62 = vadd.f32 %v2799_v0, %v5474_v31  ;;  %v4154_v63 = vpop.f32.mrb[10].mxu0 }
 0x1fa   : > { %v4187_v49 = vadd.f32 %v4154_v63, %v5476_v26  ;;  %v2802_v54 = vpop.f32.mrb[11].mxu0  ;;  %v2943_v45 = vadd.f32 %v4185_v20, %v5492_v52 }
 0x1fb   : > { %v3199_v36 = vadd.f32 %v3198_v57, %v3168_v22  ;;  %v2941_v19 = vadd.f32 %v4186_v62, %v5492_v52  ;;  %v3131_v16 = vadd.f32 %v3130_v30, %v2940_v35  ;;  %v4188_v3 = vadd.f32 %v2802_v54, %v5478_v29 }
 0x1fc   : > { %v2944_v4 = vadd.f32 %v4187_v49, %v5492_v52  ;;  %v3172_v58 = vmul.f32 %v2943_v45, %v2943_v45 }
 0x1fd   : > { %v3132_v11 = vadd.f32 %v3131_v16, %v2941_v19  ;;  %v3170_v21 = vmul.f32 %v2941_v19, %v2941_v19  ;;  %v3200_v31 = vadd.f32 %v3199_v36, %v3169_v5  ;;  %v2942_v13 = vadd.f32 %v4188_v3, %v5492_v52 }
 0x1fe   : > { %v3649_v24 = vpack.c.bf16 %v2944_v4, %v2943_v45  ;;  %v3173_v7 = vmul.f32 %v2944_v4, %v2944_v4 }
 0x1ff   : > { %v3201_v26 = vadd.f32 %v3200_v31, %v3170_v21  ;;  %v3644_v9 = vpack.c.bf16 %v2942_v13, %v2941_v19  ;;  %v3133_v10 = vadd.f32 %v3132_v11, %v2942_v13  ;;  %v3171_v51 = vmul.f32 %v2942_v13, %v2942_v13  ;;  %v4157_v33 = vpop.f32.mrb[12].mxu0 }
 0x200   : > { %3705 = vst [vmem:[%s5500_s24 + $0x28] sm:$0xff] %v3649_v24   ;;  %v4189_v39 = vadd.f32 %v4157_v33, %v5480_v44  ;;  %v2815_v29 = vpop.f32.mrb[13].mxu0 }
 0x201   : > { %3704 = vst [vmem:[%s5500_s24 + $0x20] sm:$0xff] %v3644_v9   ;;  %v3134_v42 = vadd.f32 %v3133_v10, %v2943_v45  ;;  %v3202_v15 = vadd.f32 %v3201_v26, %v3171_v51  ;;  %v4190_v27 = vadd.f32 %v2815_v29, %v5483_v8  ;;  %v4158_v6 = vpop.f32.mrb[14].mxu0 }
 0x202   : > { %v4191_v60 = vadd.f32 %v4158_v6, %v5485_v1  ;;  %v2818_v14 = vpop.f32.mrb[15].mxu0  ;;  %v2947_v44 = vadd.f32 %v4189_v39, %v5492_v52 }
 0x203   : > { %v3203_v28 = vadd.f32 %v3202_v15, %v3172_v58  ;;  %v2945_v25 = vadd.f32 %v4190_v27, %v5492_v52  ;;  %v3135_v38 = vadd.f32 %v3134_v42, %v2944_v4  ;;  %v4192_v46 = vadd.f32 %v2818_v14, %v5487_v40 }
 0x204   : > { %v2948_v47 = vadd.f32 %v4191_v60, %v5492_v52  ;;  %v3176_v56 = vmul.f32 %v2947_v44, %v2947_v44 }
 0x205   : > { %v3136_v32 = vadd.f32 %v3135_v38, %v2945_v25  ;;  %v3174_v18 = vmul.f32 %v2945_v25, %v2945_v25  ;;  %v3204_v8 = vadd.f32 %v3203_v28, %v3173_v7  ;;  %v2946_v43 = vadd.f32 %v4192_v46, %v5492_v52 }
 0x206   : > { %v3659_v55 = vpack.c.bf16 %v2948_v47, %v2947_v44  ;;  %v3177_v50 = vmul.f32 %v2948_v47, %v2948_v47 }
 0x207   : > { %v3205_v1 = vadd.f32 %v3204_v8, %v3174_v18  ;;  %v3654_v12 = vpack.c.bf16 %v2946_v43, %v2945_v25  ;;  %v3137_v23 = vadd.f32 %v3136_v32, %v2946_v43  ;;  %v3175_v59 = vmul.f32 %v2946_v43, %v2946_v43  ;;  %v4025_v35 = vpop.f32.mrb[16].mxu1  ;;  %v4161_v48 = vpop.f32.mrb[16].mxu0 }
 0x208   : > { %3707 = vst [vmem:[%s5500_s24 + $0x38] sm:$0xff] %v3659_v55   ;;  %v4193_v2 = vadd.f32 %v4161_v48, %v4025_v35  ;;  %v1973_v40 = vpop.f32.mrb[17].mxu1  ;;  %v2831_v61 = vpop.f32.mrb[17].mxu0 }
 0x209   : > { %3706 = vst [vmem:[%s5500_s24 + $0x30] sm:$0xff] %v3654_v12   ;;  %v3138_v53 = vadd.f32 %v3137_v23, %v2947_v44  ;;  %v3206_v17 = vadd.f32 %v3205_v1, %v3175_v59  ;;  %v4194_v34 = vadd.f32 %v2831_v61, %v1973_v40  ;;  %v4026_v37 = vpop.f32.mrb[18].mxu1  ;;  %v4162_v41 = vpop.f32.mrb[18].mxu0 }
 0x20a   : > { %v4195_v20 = vadd.f32 %v4162_v41, %v4026_v37  ;;  %v1976_v0 = vpop.f32.mrb[19].mxu1  ;;  %v2834_v22 = vpop.f32.mrb[19].mxu0  ;;  %v2951_v5 = vadd.f32 %v4193_v2, %v5492_v52 }
 0x20b   : > { %v3207_v30 = vadd.f32 %v3206_v17, %v3176_v56  ;;  %v2949_v57 = vadd.f32 %v4194_v34, %v5492_v52  ;;  %v3139_v62 = vadd.f32 %v3138_v53, %v2948_v47  ;;  %v4196_v63 = vadd.f32 %v2834_v22, %v1976_v0 }
 0x20c   : > { %v2952_v49 = vadd.f32 %v4195_v20, %v5492_v52  ;;  %v3180_v10 = vmul.f32 %v2951_v5, %v2951_v5 }
 0x20d   : > { %v3140_v54 = vadd.f32 %v3139_v62, %v2949_v57  ;;  %v3178_v36 = vmul.f32 %v2949_v57, %v2949_v57  ;;  %v3208_v19 = vadd.f32 %v3207_v30, %v3177_v50  ;;  %v2950_v16 = vadd.f32 %v4196_v63, %v5492_v52 }
 0x20e   : > { %v3669_v3 = vpack.c.bf16 %v2952_v49, %v2951_v5  ;;  %v3181_v42 = vmul.f32 %v2952_v49, %v2952_v49 }
 0x20f   : > { %v3209_v45 = vadd.f32 %v3208_v19, %v3178_v36  ;;  %v3664_v4 = vpack.c.bf16 %v2950_v16, %v2949_v57  ;;  %v3141_v11 = vadd.f32 %v3140_v54, %v2950_v16  ;;  %v3179_v21 = vmul.f32 %v2950_v16, %v2950_v16  ;;  %v4029_v31 = vpop.f32.mrb[20].mxu1  ;;  %v4165_v13 = vpop.f32.mrb[20].mxu0 }
 0x210   : > { %3709 = vst [vmem:[%s5500_s24 + $0x48] sm:$0xff] %v3669_v3   ;;  %v4197_v24 = vadd.f32 %v4165_v13, %v4029_v31  ;;  %v1989_v26 = vpop.f32.mrb[21].mxu1  ;;  %v2847_v9 = vpop.f32.mrb[21].mxu0 }
 0x211   : > { %3708 = vst [vmem:[%s5500_s24 + $0x40] sm:$0xff] %v3664_v4   ;;  %v3142_v51 = vadd.f32 %v3141_v11, %v2951_v5  ;;  %v3210_v33 = vadd.f32 %v3209_v45, %v3179_v21  ;;  %v4198_v39 = vadd.f32 %v2847_v9, %v1989_v26  ;;  %v4030_v29 = vpop.f32.mrb[22].mxu1  ;;  %v4166_v58 = vpop.f32.mrb[22].mxu0 }
 0x212   : > { %v4199_v15 = vadd.f32 %v4166_v58, %v4030_v29  ;;  %v1992_v27 = vpop.f32.mrb[23].mxu1  ;;  %v2850_v6 = vpop.f32.mrb[23].mxu0  ;;  %v2955_v25 = vadd.f32 %v4197_v24, %v5492_v52 }
 0x213   : > { %v3211_v7 = vadd.f32 %v3210_v33, %v3180_v10  ;;  %v2953_v60 = vadd.f32 %v4198_v39, %v5492_v52  ;;  %v3143_v14 = vadd.f32 %v3142_v51, %v2952_v49  ;;  %v4200_v28 = vadd.f32 %v2850_v6, %v1992_v27 }
 0x214   : > { %v2956_v38 = vadd.f32 %v4199_v15, %v5492_v52  ;;  %v3184_v2 = vmul.f32 %v2955_v25, %v2955_v25 }
 0x215   : > { %v3144_v46 = vadd.f32 %v3143_v14, %v2953_v60  ;;  %v3182_v44 = vmul.f32 %v2953_v60, %v2953_v60  ;;  %v3212_v47 = vadd.f32 %v3211_v7, %v3181_v42  ;;  %v2954_v32 = vadd.f32 %v4200_v28, %v5492_v52 }
 0x216   : > { %v3679_v18 = vpack.c.bf16 %v2956_v38, %v2955_v25  ;;  %v3185_v34 = vmul.f32 %v2956_v38, %v2956_v38 }
 0x217   : > { %v3213_v8 = vadd.f32 %v3212_v47, %v3182_v44  ;;  %v3674_v43 = vpack.c.bf16 %v2954_v32, %v2953_v60  ;;  %v3145_v55 = vadd.f32 %v3144_v46, %v2954_v32  ;;  %v3183_v1 = vmul.f32 %v2954_v32, %v2954_v32  ;;  %v4033_v12 = vpop.f32.mrb[24].mxu1  ;;  %v4169_v23 = vpop.f32.mrb[24].mxu0 }
 0x218   : > { %3711 = vst [vmem:[%s5500_s24 + $0x58] sm:$0xff] %v3679_v18   ;;  %v4201_v59 = vadd.f32 %v4169_v23, %v4033_v12  ;;  %v2005_v35 = vpop.f32.mrb[25].mxu1  ;;  %v2863_v48 = vpop.f32.mrb[25].mxu0 }
 0x219   : > { %3710 = vst [vmem:[%s5500_s24 + $0x50] sm:$0xff] %v3674_v43   ;;  %v3146_v40 = vadd.f32 %v3145_v55, %v2955_v25  ;;  %v3214_v61 = vadd.f32 %v3213_v8, %v3183_v1  ;;  %v4202_v56 = vadd.f32 %v2863_v48, %v2005_v35  ;;  %v4034_v53 = vpop.f32.mrb[26].mxu1  ;;  %v4170_v17 = vpop.f32.mrb[26].mxu0 }
 0x21a   : > { %v4203_v37 = vadd.f32 %v4170_v17, %v4034_v53  ;;  %v2008_v41 = vpop.f32.mrb[27].mxu1  ;;  %v2866_v50 = vpop.f32.mrb[27].mxu0  ;;  %v2959_v57 = vadd.f32 %v4201_v59, %v5492_v52 }
 0x21b   : > { %v3215_v20 = vadd.f32 %v3214_v61, %v3184_v2  ;;  %v2957_v0 = vadd.f32 %v4202_v56, %v5492_v52  ;;  %v3147_v22 = vadd.f32 %v3146_v40, %v2956_v38  ;;  %v4204_v30 = vadd.f32 %v2866_v50, %v2008_v41 }
 0x21c   : > { %v2960_v62 = vadd.f32 %v4203_v37, %v5492_v52  ;;  %v3188_v24 = vmul.f32 %v2959_v57, %v2959_v57 }
 0x21d   : > { %v3148_v63 = vadd.f32 %v3147_v22, %v2957_v0  ;;  %v3186_v5 = vmul.f32 %v2957_v0, %v2957_v0  ;;  %v3216_v49 = vadd.f32 %v3215_v20, %v3185_v34  ;;  %v2958_v54 = vadd.f32 %v4204_v30, %v5492_v52 }
 0x21e   : > { %v3689_v36 = vpack.c.bf16 %v2960_v62, %v2959_v57  ;;  %v3189_v39 = vmul.f32 %v2960_v62, %v2960_v62 }
 0x21f   : > { %v3217_v19 = vadd.f32 %v3216_v49, %v3186_v5  ;;  %v3684_v16 = vpack.c.bf16 %v2958_v54, %v2957_v0  ;;  %v3149_v3 = vadd.f32 %v3148_v63, %v2958_v54  ;;  %v3187_v45 = vmul.f32 %v2958_v54, %v2958_v54  ;;  %v4037_v4 = vpop.f32.mrb[28].mxu1  ;;  %v4173_v11 = vpop.f32.mrb[28].mxu0 }
 0x220   : > { %3713 = vst [vmem:[%s5500_s24 + $0x68] sm:$0xff] %v3689_v36   ;;  %v4205_v21 = vadd.f32 %v4173_v11, %v4037_v4  ;;  %v2021_v31 = vpop.f32.mrb[29].mxu1  ;;  %v2879_v13 = vpop.f32.mrb[29].mxu0 }
 0x221   : > { %3712 = vst [vmem:[%s5500_s24 + $0x60] sm:$0xff] %v3684_v16   ;;  %v3150_v26 = vadd.f32 %v3149_v3, %v2959_v57  ;;  %v3218_v9 = vadd.f32 %v3217_v19, %v3187_v45  ;;  %v4206_v10 = vadd.f32 %v2879_v13, %v2021_v31  ;;  %v4038_v51 = vpop.f32.mrb[30].mxu1  ;;  %v4174_v33 = vpop.f32.mrb[30].mxu0 }
 0x222   : > { %v4207_v29 = vadd.f32 %v4174_v33, %v4038_v51  ;;  %v2024_v58 = vpop.f32.mrb[31].mxu1  ;;  %v2882_v42 = vpop.f32.mrb[31].mxu0  ;;  %v2963_v60 = vadd.f32 %v4205_v21, %v5492_v52 }
 0x223   : > { %v3219_v15 = vadd.f32 %v3218_v9, %v3188_v24  ;;  %v2961_v27 = vadd.f32 %v4206_v10, %v5492_v52  ;;  %v3151_v6 = vadd.f32 %v3150_v26, %v2960_v62  ;;  %v4208_v7 = vadd.f32 %v2882_v42, %v2024_v58 }
 0x224   : > { %v2964_v14 = vadd.f32 %v4207_v29, %v5492_v52  ;;  %v3192_v43 = vmul.f32 %v2963_v60, %v2963_v60 }
 0x225   : > { %v3152_v28 = vadd.f32 %v3151_v6, %v2961_v27  ;;  %v3190_v25 = vmul.f32 %v2961_v27, %v2961_v27  ;;  %v3220_v38 = vadd.f32 %v3219_v15, %v3189_v39  ;;  %v2962_v46 = vadd.f32 %v4208_v7, %v5492_v52 }
 0x226   : > { %v3699_v44 = vpack.c.bf16 %v2964_v14, %v2963_v60  ;;  %v3193_v12 = vmul.f32 %v2964_v14, %v2964_v14 }
 0x227   : > { %v3221_v47 = vadd.f32 %v3220_v38, %v3190_v25  ;;  %v3694_v32 = vpack.c.bf16 %v2962_v46, %v2961_v27  ;;  %v3153_v18 = vadd.f32 %v3152_v28, %v2962_v46  ;;  %v3191_v8 = vmul.f32 %v2962_v46, %v2962_v46 }
 0x228   : > { %3715 = vst [vmem:[%s5500_s24 + $0x78] sm:$0xff] %v3699_v44  }
 0x229   : > { %3714 = vst [vmem:[%s5500_s24 + $0x70] sm:$0xff] %v3694_v32   ;;  %v3154_v55 = vadd.f32 %v3153_v18, %v2963_v60  ;;  %v3222_v1 = vadd.f32 %v3221_v47, %v3191_v8 }
 0x22b   : > { %v3155_v23 = vadd.f32 %v3154_v55, %v2964_v14  ;;  %v3223_v59 = vadd.f32 %v3222_v1, %v3192_v43 }
 0x22d   : > { %v3156_v35 = vrot.slane %v3155_v23, 4  ;;  %v3224_v48 = vadd.f32 %v3223_v59, %v3193_v12 }
 0x22f   : > { %v3157_v2 = vadd.f32 %v3156_v35, %v3155_v23  ;;  %v3225_v40 = vrot.slane %v3224_v48, 4 }
 0x231   : > { %v3158_v61 = vrot.slane %v3157_v2, 2  ;;  %v3226_v52 = vadd.f32 %v3225_v40, %v3224_v48 }
 0x233   : > { %v3159_v56 = vadd.f32 %v3158_v61, %v3157_v2  ;;  %v3227_v53 = vrot.slane %v3226_v52, 2 }
 0x235   : > { %v3160_v17 = vrot.slane %v3159_v56, 1  ;;  %v3228_v34 = vadd.f32 %v3227_v53, %v3226_v52 }
 0x237   : > { %v3229_v37 = vrot.slane %v3228_v34, 1  ;;  %v3161_v41 = vadd.f32 %v3160_v17, %v3159_v56 }
 0x239   : > { %v3230_v50 = vadd.f32 %v3229_v37, %v3228_v34 }
 0x23b   : > { %v3232_v20 = vsel %vm3231_vm8, %v3161_v41, %v3230_v50 }
 0x23c   : > { %3233 = vst [vmem:[%s209_s28] sm:$0x3] %v3232_v20 }
 0x23d PF: > { %s15_s15 = sadd.s32 1, %s4480_s15  }
 0x23e   : > { %p12_p5 = scmp.ge.s32.totalorder %s15_s15, 4  }
 0x240   :  { %14 = sbr.rel (!%p12_p5) target bundleno = 1 (0x1), region = 82 }

</bundles_post_ra>
